<compile_context>
chip_gen: v6e
topology: v6e:2x2x1
jax: 0.10.0
libtpu: 0.0.40
codegen_flags: <defaults>
</compile_context>

<pallas_src>
import jax
import jax.numpy as jnp
from jax import lax
from jax.experimental import pallas as pl
from jax.experimental.pallas import tpu as pltpu  # noqa: F401  (imported per template)

# Small, deterministic hyperparameters consistent with the module.
VOCAB_SIZE = 100
EMBED_DIMS = 16
UNITS = 32             # GRU hidden size per direction
SEQ_LEN = 35           # nn.Linear(Units * 2 * 35, NumClasses) fixes this to 35
NUM_CLASSES = 6
BATCH = 2


def _full_spec(shape):
    # One grid step, whole-array block resident in VMEM.
    return pl.BlockSpec(shape, lambda i: (0,) * len(shape))


# ----------------------------------------------------------------------------
# Single fused kernel: embedding (one-hot matmul on the pre-folded table),
# bidirectional GRU (PyTorch gate order r, z, n), ReLU, FC, Softmax.
# ----------------------------------------------------------------------------
def _fused_kernel(tok_ref, table_ref, whh_ref, w3_ref, fcb_ref, out_ref):
    N = SEQ_LEN                      # RNN batch (the 35 positions)
    T = tok_ref.shape[0] // N        # GRU time (= module batch = 2)
    V = table_ref.shape[0]           # 100
    U = UNITS
    G = 3 * U                        # 96 gate columns [r | z | n] per direction

    tok_col = tok_ref[...]           # (T*N, 1) int32, row r = t*N + n
    table = table_ref[...]           # (V, 2G) bf16: [fwd r z n | bwd r z n] = emb@W_ih^T + b_ih
    whh = whh_ref[...]               # (2U+1, 2G) bf16: block-diag W_hh^T (both dirs) + b_hh row

    # --- Embedding + input projection + b_ih, both directions & both steps,
    #     as a single one-hot MXU matmul on the pre-folded table.
    #     (Out-of-range token ids yield an all-zero row; PyTorch would error.)
    lane_v = lax.broadcasted_iota(jnp.int32, (T * N, V), 1)
    onehot = (lane_v == tok_col).astype(jnp.bfloat16)                       # (T*N, V)
    gi_all = jnp.dot(onehot, table, preferred_element_type=jnp.float32)     # (T*N, 2G)
    gi_f = [gi_all[t * N:(t + 1) * N, :G] for t in range(T)]                # W_i x + b_ih (fwd)
    gi_b = [gi_all[t * N:(t + 1) * N, G:] for t in range(T)]                # (bwd)

    # b_hh (both directions) lives in the last row of `whh`; it is activated by
    # a ones column appended to [h_f | h_b] in the fused hidden matmul.
    bias_row = whh[2 * U:2 * U + 1, :].astype(jnp.float32)                  # (1, 2G)
    ones_col = jnp.ones((N, 1), jnp.bfloat16)

    def gate_update(h, gi_d, gh_d):
        # PyTorch GRU gate order (r, z, n); gh_d already contains b_hh.
        rz = jax.nn.sigmoid(gi_d[:, :2 * U] + gh_d[:, :2 * U])              # fused r|z sigmoid
        r = rz[:, :U]
        z = rz[:, U:]
        n = jnp.tanh(gi_d[:, 2 * U:] + r * gh_d[:, 2 * U:])
        return (1.0 - z) * n + z * h

    # --- Bidirectional recurrence, fully unrolled (T == 2); hidden state stays
    #     in registers.  ONE (N, 2U+1) x (2U+1, 2G) matmul per step serves both
    #     directions; step 0 needs no matmul at all (h == 0 => gh = b_hh).
    h_f = jnp.zeros((N, U), jnp.float32)
    h_b = jnp.zeros((N, U), jnp.float32)
    out_f = [None] * T
    out_b = [None] * T
    for s in range(T):
        if s == 0:
            gh = jnp.broadcast_to(bias_row, (N, 2 * G))
        else:
            h_aug = jnp.concatenate([h_f.astype(jnp.bfloat16),
                                     h_b.astype(jnp.bfloat16), ones_col], axis=1)
            gh = jnp.dot(h_aug, whh, preferred_element_type=jnp.float32)    # (N, 2G)
        h_f = gate_update(h_f, gi_f[s], gh[:, :G])
        out_f[s] = h_f
        tb = T - 1 - s
        h_b = gate_update(h_b, gi_b[tb], gh[:, G:])
        out_b[tb] = h_b

    # --- Flatten + ReLU + Linear + Softmax, without a rank-4 intermediate and
    #     without relayout to (T, N*2U):
    #     logits[t, c] = sum_{n,f} relu(cat(h_f,h_b)[t, n, f]) * W3[c, n, f] + b[c]
    rows = []
    for t in range(T):
        x_t = jnp.maximum(jnp.concatenate([out_f[t], out_b[t]], axis=1), 0.0)   # (N, 2U) f32
        cols = [jnp.sum(x_t * w3_ref[c], axis=1, keepdims=True)                 # (N, 1)
                for c in range(NUM_CLASSES)]
        rows.append(jnp.sum(jnp.concatenate(cols, axis=1), axis=0,
                            keepdims=True))                                     # (1, C)
    logits = jnp.concatenate(rows, axis=0) + fcb_ref[...]                       # (T, C)

    # --- Softmax(dim=1)
    m = jnp.max(logits, axis=1, keepdims=True)
    e = jnp.exp(logits - m)
    out_ref[...] = e / jnp.sum(e, axis=1, keepdims=True)


def text_classification_forward(tokens, p):
    # batch_first=False: the module's batch axis (size 2) IS the serial GRU
    # recurrence axis, so there is no independent batch dimension to put on a
    # parallel grid for this module.
    # TODO(synk): if many independent (2, 35) examples are ever processed in one
    # call, add a leading grid axis (weights with constant index_map stay
    # resident) and dimension_semantics=("parallel",) to use both v7x cores.
    T, N = tokens.shape                                  # (2, 35)
    tok_col = tokens.astype(jnp.int32).reshape(T * N, 1)  # free row-major view, row = t*N + n
    return pl.pallas_call(
        _fused_kernel,
        grid=(1,),
        in_specs=[
            _full_spec((T * N, 1)),
            _full_spec((VOCAB_SIZE, 6 * UNITS)),
            _full_spec((2 * UNITS + 1, 6 * UNITS)),
            _full_spec((NUM_CLASSES, SEQ_LEN, 2 * UNITS)),
            _full_spec((1, NUM_CLASSES)),
        ],
        out_specs=_full_spec((T, NUM_CLASSES)),
        out_shape=jax.ShapeDtypeStruct((T, NUM_CLASSES), jnp.float32),
    )(tok_col, p["table"], p["whh"], p["w3"], p["fc_b"])


# ----------------------------------------------------------------------------
# Deterministic parameter init (PyTorch-shaped), packing, and pure-JAX reference.
# ----------------------------------------------------------------------------
def init_raw_params(key):
    ks = jax.random.split(key, 11)
    gru_bound = 1.0 / (UNITS ** 0.5)
    fc_bound = 1.0 / ((2 * UNITS * SEQ_LEN) ** 0.5)

    def u(k, shape, bound):
        return jax.random.uniform(k, shape, jnp.float32, -bound, bound)

    return {
        "embedding": jax.random.normal(ks[0], (VOCAB_SIZE, EMBED_DIMS), jnp.float32),
        "w_ih_f": u(ks[1], (3 * UNITS, EMBED_DIMS), gru_bound),
        "w_hh_f": u(ks[2], (3 * UNITS, UNITS), gru_bound),
        "b_ih_f": u(ks[3], (3 * UNITS,), gru_bound),
        "b_hh_f": u(ks[4], (3 * UNITS,), gru_bound),
        "w_ih_b": u(ks[5], (3 * UNITS, EMBED_DIMS), gru_bound),
        "w_hh_b": u(ks[6], (3 * UNITS, UNITS), gru_bound),
        "b_ih_b": u(ks[7], (3 * UNITS,), gru_bound),
        "b_hh_b": u(ks[8], (3 * UNITS,), gru_bound),
        "fc_w": u(ks[9], (NUM_CLASSES, 2 * UNITS * SEQ_LEN), fc_bound),
        "fc_b": u(ks[10], (NUM_CLASSES,), fc_bound),
    }


def pack_for_kernel(raw):
    emb = raw["embedding"]                                     # (V, E)
    U = UNITS

    def fold_dir(w_ih, b_ih):
        # gi(token) = emb[token] @ w_ih.T + b_ih, gate columns [r | z | n]
        return jnp.dot(emb, w_ih.T,
                       precision=jax.lax.Precision.HIGHEST) + b_ih[None, :]

    table = jnp.concatenate([fold_dir(raw["w_ih_f"], raw["b_ih_f"]),
                             fold_dir(raw["w_ih_b"], raw["b_ih_b"])], axis=1)  # (V, 6U)

    # Block-diagonal hidden weights (fwd | bwd) with b_hh folded as a last row.
    whh = jnp.zeros((2 * U + 1, 6 * U), jnp.float32)
    whh = whh.at[0:U, 0:3 * U].set(raw["w_hh_f"].T)
    whh = whh.at[U:2 * U, 3 * U:6 * U].set(raw["w_hh_b"].T)
    whh = whh.at[2 * U, 0:3 * U].set(raw["b_hh_f"])
    whh = whh.at[2 * U, 3 * U:6 * U].set(raw["b_hh_b"])

    return {
        "table": table.astype(jnp.bfloat16),                        # (V, 6U) bf16
        "whh": whh.astype(jnp.bfloat16),                            # (2U+1, 6U) bf16
        "w3": raw["fc_w"].reshape(NUM_CLASSES, SEQ_LEN, 2 * UNITS),  # (C, 35, 2U) f32
        "fc_b": raw["fc_b"][None, :],                               # (1, C) f32
    }


def reference_forward(tokens, raw):
    emb = raw["embedding"][tokens]             # (B, 35, E); axis 0 = GRU time
    U = UNITS

    def direction(w_ih, w_hh, b_ih, b_hh, reverse):
        def step(h, x):
            gi = x @ w_ih.T + b_ih
            gh = h @ w_hh.T + b_hh
            r = jax.nn.sigmoid(gi[:, :U] + gh[:, :U])
            z = jax.nn.sigmoid(gi[:, U:2 * U] + gh[:, U:2 * U])
            n = jnp.tanh(gi[:, 2 * U:] + r * gh[:, 2 * U:])
            h_new = (1.0 - z) * n + z * h
            return h_new, h_new

        h0 = jnp.zeros((emb.shape[1], U), jnp.float32)
        _, hs = lax.scan(step, h0, emb, reverse=reverse)
        return hs

    out_f = direction(raw["w_ih_f"], raw["w_hh_f"], raw["b_ih_f"], raw["b_hh_f"], False)
    out_b = direction(raw["w_ih_b"], raw["w_hh_b"], raw["b_ih_b"], raw["b_hh_b"], True)
    out = jnp.concatenate([out_f, out_b], axis=-1)
    feats = jnp.maximum(out.reshape(out.shape[0], -1), 0.0)
    logits = feats @ raw["fc_w"].T + raw["fc_b"]
    return jax.nn.softmax(logits, axis=1)


if __name__ == "__main__":
    key = jax.random.PRNGKey(0)
    k_params, k_tokens = jax.random.split(key)

    raw = init_raw_params(k_params)
    packed = pack_for_kernel(raw)
    tokens = jax.random.randint(k_tokens, (BATCH, SEQ_LEN), 0, VOCAB_SIZE,
                                dtype=jnp.int32)

    out = text_classification_forward(tokens, packed)
    out = jax.block_until_ready(out)

    assert out.shape == (BATCH, NUM_CLASSES)
    assert bool(jnp.all(jnp.isfinite(out)))
    assert bool(jnp.allclose(jnp.sum(out, axis=1), 1.0, atol=1e-3))

    ref = reference_forward(tokens, raw)
    assert bool(jnp.allclose(out, ref, atol=2e-2, rtol=2e-2))

    print("KERNEL_OK")
</pallas_src>

<mosaic_0001>
module attributes {stable_mosaic.version = 11 : i64} {
  func.func @_fused_kernel(%arg0: i32, %arg1: memref<70x1xi32, #tpu.memory_space<vmem>>, %arg2: memref<100x192xbf16, #tpu.memory_space<vmem>>, %arg3: memref<65x192xbf16, #tpu.memory_space<vmem>>, %arg4: memref<6x35x64xf32, #tpu.memory_space<vmem>>, %arg5: memref<1x6xf32, #tpu.memory_space<vmem>>, %arg6: memref<2x6xf32, #tpu.memory_space<vmem>>) attributes {dimension_semantics = [#tpu.dimension_semantics<arbitrary>], iteration_bounds = array<i64: 1>, scalar_prefetch = 0 : i64, scratch_operands = 0 : i64, tpu.core_type = #tpu.core_type<tc>, window_params = [{pipeline_mode = #tpu.pipeline_mode<synchronous>, transform_indices = @transform_0, window_bounds = array<i64: 70, 1>}, {pipeline_mode = #tpu.pipeline_mode<synchronous>, transform_indices = @transform_1, window_bounds = array<i64: 100, 192>}, {pipeline_mode = #tpu.pipeline_mode<synchronous>, transform_indices = @transform_2, window_bounds = array<i64: 65, 192>}, {pipeline_mode = #tpu.pipeline_mode<synchronous>, transform_indices = @transform_3, window_bounds = array<i64: 6, 35, 64>}, {pipeline_mode = #tpu.pipeline_mode<synchronous>, transform_indices = @transform_4, window_bounds = array<i64: 1, 6>}, {pipeline_mode = #tpu.pipeline_mode<synchronous>, transform_indices = @transform_5, window_bounds = array<i64: 2, 6>}]} {
    %c0 = arith.constant 0 : index
    %c0_0 = arith.constant 0 : index
    %0 = vector.load %arg1[%c0, %c0_0] : memref<70x1xi32, #tpu.memory_space<vmem>>, vector<70x1xi32>
    %c0_1 = arith.constant 0 : index
    %c0_2 = arith.constant 0 : index
    %1 = vector.load %arg2[%c0_1, %c0_2] : memref<100x192xbf16, #tpu.memory_space<vmem>>, vector<100x192xbf16>
    %c0_3 = arith.constant 0 : index
    %c0_4 = arith.constant 0 : index
    %2 = vector.load %arg3[%c0_3, %c0_4] : memref<65x192xbf16, #tpu.memory_space<vmem>>, vector<65x192xbf16>
    %3 = tpu.iota {dimensions = array<i32: 1>} : vector<70x100xi32>
    %4 = vector.broadcast %0 : vector<70x1xi32> to vector<70x100xi32>
    %5 = arith.cmpi eq, %3, %4 : vector<70x100xi32>
    %6 = arith.extui %5 : vector<70x100xi1> to vector<70x100xi32>
    %7 = arith.sitofp %6 : vector<70x100xi32> to vector<70x100xf32>
    %8 = arith.truncf %7 : vector<70x100xf32> to vector<70x100xbf16>
    %cst = arith.constant dense<0.000000e+00> : vector<70x192xf32>
    %9 = tpu.matmul %8, %1, %cst {dimension_numbers = #tpu.dot_dimension_numbers<[1], [0], [0], [1], [0, 0, 1, 1], [], []>} : vector<70x100xbf16>, vector<100x192xbf16>, vector<70x192xf32> -> vector<70x192xf32>
    %10 = vector.extract_strided_slice %9 {offsets = [0, 0], sizes = [35, 96], strides = [1, 1]} : vector<70x192xf32> to vector<35x96xf32>
    %11 = vector.extract_strided_slice %9 {offsets = [35, 0], sizes = [35, 96], strides = [1, 1]} : vector<70x192xf32> to vector<35x96xf32>
    %12 = vector.extract_strided_slice %9 {offsets = [0, 96], sizes = [35, 96], strides = [1, 1]} : vector<70x192xf32> to vector<35x96xf32>
    %13 = vector.extract_strided_slice %9 {offsets = [35, 96], sizes = [35, 96], strides = [1, 1]} : vector<70x192xf32> to vector<35x96xf32>
    %14 = vector.extract_strided_slice %2 {offsets = [64, 0], sizes = [1, 192], strides = [1, 1]} : vector<65x192xbf16> to vector<1x192xbf16>
    %15 = arith.extf %14 : vector<1x192xbf16> to vector<1x192xf32>
    %cst_5 = arith.constant 1.000000e+00 : bf16
    %16 = vector.broadcast %cst_5 : bf16 to vector<35x1xbf16>
    %cst_6 = arith.constant 0.000000e+00 : f32
    %17 = vector.broadcast %cst_6 : f32 to vector<35x32xf32>
    %cst_7 = arith.constant 0.000000e+00 : f32
    %18 = vector.broadcast %cst_7 : f32 to vector<35x32xf32>
    %19 = vector.shape_cast %15 : vector<1x192xf32> to vector<1x192xf32>
    %20 = vector.broadcast %19 : vector<1x192xf32> to vector<35x192xf32>
    %21 = vector.extract_strided_slice %20 {offsets = [0, 0], sizes = [35, 96], strides = [1, 1]} : vector<35x192xf32> to vector<35x96xf32>
    %22 = vector.extract_strided_slice %10 {offsets = [0, 0], sizes = [35, 64], strides = [1, 1]} : vector<35x96xf32> to vector<35x64xf32>
    %23 = vector.extract_strided_slice %21 {offsets = [0, 0], sizes = [35, 64], strides = [1, 1]} : vector<35x96xf32> to vector<35x64xf32>
    %24 = arith.addf %22, %23 : vector<35x64xf32>
    %25 = arith.negf %24 : vector<35x64xf32>
    %26 = math.exp %25 : vector<35x64xf32>
    %cst_8 = arith.constant 1.000000e+00 : f32
    %27 = vector.broadcast %cst_8 : f32 to vector<35x64xf32>
    %28 = arith.addf %27, %26 : vector<35x64xf32>
    %29 = arith.divf %27, %28 : vector<35x64xf32>
    %30 = vector.extract_strided_slice %29 {offsets = [0, 0], sizes = [35, 32], strides = [1, 1]} : vector<35x64xf32> to vector<35x32xf32>
    %31 = vector.extract_strided_slice %29 {offsets = [0, 32], sizes = [35, 32], strides = [1, 1]} : vector<35x64xf32> to vector<35x32xf32>
    %32 = vector.extract_strided_slice %10 {offsets = [0, 64], sizes = [35, 32], strides = [1, 1]} : vector<35x96xf32> to vector<35x32xf32>
    %33 = vector.extract_strided_slice %21 {offsets = [0, 64], sizes = [35, 32], strides = [1, 1]} : vector<35x96xf32> to vector<35x32xf32>
    %34 = arith.mulf %30, %33 : vector<35x32xf32>
    %35 = arith.addf %32, %34 : vector<35x32xf32>
    %36 = math.tanh %35 : vector<35x32xf32>
    %cst_9 = arith.constant 1.000000e+00 : f32
    %37 = vector.broadcast %cst_9 : f32 to vector<35x32xf32>
    %38 = arith.subf %37, %31 : vector<35x32xf32>
    %39 = arith.mulf %38, %36 : vector<35x32xf32>
    %40 = arith.mulf %31, %17 : vector<35x32xf32>
    %41 = arith.addf %39, %40 : vector<35x32xf32>
    %42 = vector.extract_strided_slice %20 {offsets = [0, 96], sizes = [35, 96], strides = [1, 1]} : vector<35x192xf32> to vector<35x96xf32>
    %43 = vector.extract_strided_slice %13 {offsets = [0, 0], sizes = [35, 64], strides = [1, 1]} : vector<35x96xf32> to vector<35x64xf32>
    %44 = vector.extract_strided_slice %42 {offsets = [0, 0], sizes = [35, 64], strides = [1, 1]} : vector<35x96xf32> to vector<35x64xf32>
    %45 = arith.addf %43, %44 : vector<35x64xf32>
    %46 = arith.negf %45 : vector<35x64xf32>
    %47 = math.exp %46 : vector<35x64xf32>
    %cst_10 = arith.constant 1.000000e+00 : f32
    %48 = vector.broadcast %cst_10 : f32 to vector<35x64xf32>
    %49 = arith.addf %48, %47 : vector<35x64xf32>
    %50 = arith.divf %48, %49 : vector<35x64xf32>
    %51 = vector.extract_strided_slice %50 {offsets = [0, 0], sizes = [35, 32], strides = [1, 1]} : vector<35x64xf32> to vector<35x32xf32>
    %52 = vector.extract_strided_slice %50 {offsets = [0, 32], sizes = [35, 32], strides = [1, 1]} : vector<35x64xf32> to vector<35x32xf32>
    %53 = vector.extract_strided_slice %13 {offsets = [0, 64], sizes = [35, 32], strides = [1, 1]} : vector<35x96xf32> to vector<35x32xf32>
    %54 = vector.extract_strided_slice %42 {offsets = [0, 64], sizes = [35, 32], strides = [1, 1]} : vector<35x96xf32> to vector<35x32xf32>
    %55 = arith.mulf %51, %54 : vector<35x32xf32>
    %56 = arith.addf %53, %55 : vector<35x32xf32>
    %57 = math.tanh %56 : vector<35x32xf32>
    %cst_11 = arith.constant 1.000000e+00 : f32
    %58 = vector.broadcast %cst_11 : f32 to vector<35x32xf32>
    %59 = arith.subf %58, %52 : vector<35x32xf32>
    %60 = arith.mulf %59, %57 : vector<35x32xf32>
    %61 = arith.mulf %52, %18 : vector<35x32xf32>
    %62 = arith.addf %60, %61 : vector<35x32xf32>
    %63 = arith.truncf %41 : vector<35x32xf32> to vector<35x32xbf16>
    %64 = arith.truncf %62 : vector<35x32xf32> to vector<35x32xbf16>
    %65 = tpu.concatenate %63, %64, %16 in 1 : vector<35x32xbf16>, vector<35x32xbf16>, vector<35x1xbf16> -> vector<35x65xbf16>
    %cst_12 = arith.constant dense<0.000000e+00> : vector<35x192xf32>
    %66 = tpu.matmul %65, %2, %cst_12 {dimension_numbers = #tpu.dot_dimension_numbers<[1], [0], [0], [1], [0, 0, 1, 1], [], []>} : vector<35x65xbf16>, vector<65x192xbf16>, vector<35x192xf32> -> vector<35x192xf32>
    %67 = vector.extract_strided_slice %66 {offsets = [0, 0], sizes = [35, 96], strides = [1, 1]} : vector<35x192xf32> to vector<35x96xf32>
    %68 = vector.extract_strided_slice %11 {offsets = [0, 0], sizes = [35, 64], strides = [1, 1]} : vector<35x96xf32> to vector<35x64xf32>
    %69 = vector.extract_strided_slice %67 {offsets = [0, 0], sizes = [35, 64], strides = [1, 1]} : vector<35x96xf32> to vector<35x64xf32>
    %70 = arith.addf %68, %69 : vector<35x64xf32>
    %71 = arith.negf %70 : vector<35x64xf32>
    %72 = math.exp %71 : vector<35x64xf32>
    %cst_13 = arith.constant 1.000000e+00 : f32
    %73 = vector.broadcast %cst_13 : f32 to vector<35x64xf32>
    %74 = arith.addf %73, %72 : vector<35x64xf32>
    %75 = arith.divf %73, %74 : vector<35x64xf32>
    %76 = vector.extract_strided_slice %75 {offsets = [0, 0], sizes = [35, 32], strides = [1, 1]} : vector<35x64xf32> to vector<35x32xf32>
    %77 = vector.extract_strided_slice %75 {offsets = [0, 32], sizes = [35, 32], strides = [1, 1]} : vector<35x64xf32> to vector<35x32xf32>
    %78 = vector.extract_strided_slice %11 {offsets = [0, 64], sizes = [35, 32], strides = [1, 1]} : vector<35x96xf32> to vector<35x32xf32>
    %79 = vector.extract_strided_slice %67 {offsets = [0, 64], sizes = [35, 32], strides = [1, 1]} : vector<35x96xf32> to vector<35x32xf32>
    %80 = arith.mulf %76, %79 : vector<35x32xf32>
    %81 = arith.addf %78, %80 : vector<35x32xf32>
    %82 = math.tanh %81 : vector<35x32xf32>
    %cst_14 = arith.constant 1.000000e+00 : f32
    %83 = vector.broadcast %cst_14 : f32 to vector<35x32xf32>
    %84 = arith.subf %83, %77 : vector<35x32xf32>
    %85 = arith.mulf %84, %82 : vector<35x32xf32>
    %86 = arith.mulf %77, %41 : vector<35x32xf32>
    %87 = arith.addf %85, %86 : vector<35x32xf32>
    %88 = vector.extract_strided_slice %66 {offsets = [0, 96], sizes = [35, 96], strides = [1, 1]} : vector<35x192xf32> to vector<35x96xf32>
    %89 = vector.extract_strided_slice %12 {offsets = [0, 0], sizes = [35, 64], strides = [1, 1]} : vector<35x96xf32> to vector<35x64xf32>
    %90 = vector.extract_strided_slice %88 {offsets = [0, 0], sizes = [35, 64], strides = [1, 1]} : vector<35x96xf32> to vector<35x64xf32>
    %91 = arith.addf %89, %90 : vector<35x64xf32>
    %92 = arith.negf %91 : vector<35x64xf32>
    %93 = math.exp %92 : vector<35x64xf32>
    %cst_15 = arith.constant 1.000000e+00 : f32
    %94 = vector.broadcast %cst_15 : f32 to vector<35x64xf32>
    %95 = arith.addf %94, %93 : vector<35x64xf32>
    %96 = arith.divf %94, %95 : vector<35x64xf32>
    %97 = vector.extract_strided_slice %96 {offsets = [0, 0], sizes = [35, 32], strides = [1, 1]} : vector<35x64xf32> to vector<35x32xf32>
    %98 = vector.extract_strided_slice %96 {offsets = [0, 32], sizes = [35, 32], strides = [1, 1]} : vector<35x64xf32> to vector<35x32xf32>
    %99 = vector.extract_strided_slice %12 {offsets = [0, 64], sizes = [35, 32], strides = [1, 1]} : vector<35x96xf32> to vector<35x32xf32>
    %100 = vector.extract_strided_slice %88 {offsets = [0, 64], sizes = [35, 32], strides = [1, 1]} : vector<35x96xf32> to vector<35x32xf32>
    %101 = arith.mulf %97, %100 : vector<35x32xf32>
    %102 = arith.addf %99, %101 : vector<35x32xf32>
    %103 = math.tanh %102 : vector<35x32xf32>
    %cst_16 = arith.constant 1.000000e+00 : f32
    %104 = vector.broadcast %cst_16 : f32 to vector<35x32xf32>
    %105 = arith.subf %104, %98 : vector<35x32xf32>
    %106 = arith.mulf %105, %103 : vector<35x32xf32>
    %107 = arith.mulf %98, %62 : vector<35x32xf32>
    %108 = arith.addf %106, %107 : vector<35x32xf32>
    %109 = tpu.concatenate %41, %108 in 1 : vector<35x32xf32>, vector<35x32xf32> -> vector<35x64xf32>
    %cst_17 = arith.constant 0.000000e+00 : f32
    %110 = vector.broadcast %cst_17 : f32 to vector<35x64xf32>
    %111 = arith.maximumf %109, %110 : vector<35x64xf32>
    %c0_18 = arith.constant 0 : index
    %c0_19 = arith.constant 0 : index
    %c0_20 = arith.constant 0 : index
    %112 = vector.load %arg4[%c0_18, %c0_19, %c0_20] : memref<6x35x64xf32, #tpu.memory_space<vmem>>, vector<1x35x64xf32>
    %113 = vector.shape_cast %112 : vector<1x35x64xf32> to vector<35x64xf32>
    %114 = arith.mulf %111, %113 : vector<35x64xf32>
    %cst_21 = arith.constant dense<0.000000e+00> : vector<35xf32>
    %115 = vector.multi_reduction <add>, %114, %cst_21 [1] : vector<35x64xf32> to vector<35xf32>
    %116 = vector.shape_cast %115 : vector<35xf32> to vector<35x1xf32>
    %c1 = arith.constant 1 : index
    %c0_22 = arith.constant 0 : index
    %c0_23 = arith.constant 0 : index
    %117 = vector.load %arg4[%c1, %c0_22, %c0_23] : memref<6x35x64xf32, #tpu.memory_space<vmem>>, vector<1x35x64xf32>
    %118 = vector.shape_cast %117 : vector<1x35x64xf32> to vector<35x64xf32>
    %119 = arith.mulf %111, %118 : vector<35x64xf32>
    %cst_24 = arith.constant dense<0.000000e+00> : vector<35xf32>
    %120 = vector.multi_reduction <add>, %119, %cst_24 [1] : vector<35x64xf32> to vector<35xf32>
    %121 = vector.shape_cast %120 : vector<35xf32> to vector<35x1xf32>
    %c2 = arith.constant 2 : index
    %c0_25 = arith.constant 0 : index
    %c0_26 = arith.constant 0 : index
    %122 = vector.load %arg4[%c2, %c0_25, %c0_26] : memref<6x35x64xf32, #tpu.memory_space<vmem>>, vector<1x35x64xf32>
    %123 = vector.shape_cast %122 : vector<1x35x64xf32> to vector<35x64xf32>
    %124 = arith.mulf %111, %123 : vector<35x64xf32>
    %cst_27 = arith.constant dense<0.000000e+00> : vector<35xf32>
    %125 = vector.multi_reduction <add>, %124, %cst_27 [1] : vector<35x64xf32> to vector<35xf32>
    %126 = vector.shape_cast %125 : vector<35xf32> to vector<35x1xf32>
    %c3 = arith.constant 3 : index
    %c0_28 = arith.constant 0 : index
    %c0_29 = arith.constant 0 : index
    %127 = vector.load %arg4[%c3, %c0_28, %c0_29] : memref<6x35x64xf32, #tpu.memory_space<vmem>>, vector<1x35x64xf32>
    %128 = vector.shape_cast %127 : vector<1x35x64xf32> to vector<35x64xf32>
    %129 = arith.mulf %111, %128 : vector<35x64xf32>
    %cst_30 = arith.constant dense<0.000000e+00> : vector<35xf32>
    %130 = vector.multi_reduction <add>, %129, %cst_30 [1] : vector<35x64xf32> to vector<35xf32>
    %131 = vector.shape_cast %130 : vector<35xf32> to vector<35x1xf32>
    %c4 = arith.constant 4 : index
    %c0_31 = arith.constant 0 : index
    %c0_32 = arith.constant 0 : index
    %132 = vector.load %arg4[%c4, %c0_31, %c0_32] : memref<6x35x64xf32, #tpu.memory_space<vmem>>, vector<1x35x64xf32>
    %133 = vector.shape_cast %132 : vector<1x35x64xf32> to vector<35x64xf32>
    %134 = arith.mulf %111, %133 : vector<35x64xf32>
    %cst_33 = arith.constant dense<0.000000e+00> : vector<35xf32>
    %135 = vector.multi_reduction <add>, %134, %cst_33 [1] : vector<35x64xf32> to vector<35xf32>
    %136 = vector.shape_cast %135 : vector<35xf32> to vector<35x1xf32>
    %c5 = arith.constant 5 : index
    %c0_34 = arith.constant 0 : index
    %c0_35 = arith.constant 0 : index
    %137 = vector.load %arg4[%c5, %c0_34, %c0_35] : memref<6x35x64xf32, #tpu.memory_space<vmem>>, vector<1x35x64xf32>
    %138 = vector.shape_cast %137 : vector<1x35x64xf32> to vector<35x64xf32>
    %139 = arith.mulf %111, %138 : vector<35x64xf32>
    %cst_36 = arith.constant dense<0.000000e+00> : vector<35xf32>
    %140 = vector.multi_reduction <add>, %139, %cst_36 [1] : vector<35x64xf32> to vector<35xf32>
    %141 = vector.shape_cast %140 : vector<35xf32> to vector<35x1xf32>
    %142 = tpu.concatenate %116, %121, %126, %131, %136, %141 in 1 : vector<35x1xf32>, vector<35x1xf32>, vector<35x1xf32>, vector<35x1xf32>, vector<35x1xf32>, vector<35x1xf32> -> vector<35x6xf32>
    %cst_37 = arith.constant dense<0.000000e+00> : vector<6xf32>
    %143 = vector.multi_reduction <add>, %142, %cst_37 [0] : vector<35x6xf32> to vector<6xf32>
    %144 = vector.shape_cast %143 : vector<6xf32> to vector<1x6xf32>
    %145 = tpu.concatenate %87, %62 in 1 : vector<35x32xf32>, vector<35x32xf32> -> vector<35x64xf32>
    %cst_38 = arith.constant 0.000000e+00 : f32
    %146 = vector.broadcast %cst_38 : f32 to vector<35x64xf32>
    %147 = arith.maximumf %145, %146 : vector<35x64xf32>
    %c0_39 = arith.constant 0 : index
    %c0_40 = arith.constant 0 : index
    %c0_41 = arith.constant 0 : index
    %148 = vector.load %arg4[%c0_39, %c0_40, %c0_41] : memref<6x35x64xf32, #tpu.memory_space<vmem>>, vector<1x35x64xf32>
    %149 = vector.shape_cast %148 : vector<1x35x64xf32> to vector<35x64xf32>
    %150 = arith.mulf %147, %149 : vector<35x64xf32>
    %cst_42 = arith.constant dense<0.000000e+00> : vector<35xf32>
    %151 = vector.multi_reduction <add>, %150, %cst_42 [1] : vector<35x64xf32> to vector<35xf32>
    %152 = vector.shape_cast %151 : vector<35xf32> to vector<35x1xf32>
    %c1_43 = arith.constant 1 : index
    %c0_44 = arith.constant 0 : index
    %c0_45 = arith.constant 0 : index
    %153 = vector.load %arg4[%c1_43, %c0_44, %c0_45] : memref<6x35x64xf32, #tpu.memory_space<vmem>>, vector<1x35x64xf32>
    %154 = vector.shape_cast %153 : vector<1x35x64xf32> to vector<35x64xf32>
    %155 = arith.mulf %147, %154 : vector<35x64xf32>
    %cst_46 = arith.constant dense<0.000000e+00> : vector<35xf32>
    %156 = vector.multi_reduction <add>, %155, %cst_46 [1] : vector<35x64xf32> to vector<35xf32>
    %157 = vector.shape_cast %156 : vector<35xf32> to vector<35x1xf32>
    %c2_47 = arith.constant 2 : index
    %c0_48 = arith.constant 0 : index
    %c0_49 = arith.constant 0 : index
    %158 = vector.load %arg4[%c2_47, %c0_48, %c0_49] : memref<6x35x64xf32, #tpu.memory_space<vmem>>, vector<1x35x64xf32>
    %159 = vector.shape_cast %158 : vector<1x35x64xf32> to vector<35x64xf32>
    %160 = arith.mulf %147, %159 : vector<35x64xf32>
    %cst_50 = arith.constant dense<0.000000e+00> : vector<35xf32>
    %161 = vector.multi_reduction <add>, %160, %cst_50 [1] : vector<35x64xf32> to vector<35xf32>
    %162 = vector.shape_cast %161 : vector<35xf32> to vector<35x1xf32>
    %c3_51 = arith.constant 3 : index
    %c0_52 = arith.constant 0 : index
    %c0_53 = arith.constant 0 : index
    %163 = vector.load %arg4[%c3_51, %c0_52, %c0_53] : memref<6x35x64xf32, #tpu.memory_space<vmem>>, vector<1x35x64xf32>
    %164 = vector.shape_cast %163 : vector<1x35x64xf32> to vector<35x64xf32>
    %165 = arith.mulf %147, %164 : vector<35x64xf32>
    %cst_54 = arith.constant dense<0.000000e+00> : vector<35xf32>
    %166 = vector.multi_reduction <add>, %165, %cst_54 [1] : vector<35x64xf32> to vector<35xf32>
    %167 = vector.shape_cast %166 : vector<35xf32> to vector<35x1xf32>
    %c4_55 = arith.constant 4 : index
    %c0_56 = arith.constant 0 : index
    %c0_57 = arith.constant 0 : index
    %168 = vector.load %arg4[%c4_55, %c0_56, %c0_57] : memref<6x35x64xf32, #tpu.memory_space<vmem>>, vector<1x35x64xf32>
    %169 = vector.shape_cast %168 : vector<1x35x64xf32> to vector<35x64xf32>
    %170 = arith.mulf %147, %169 : vector<35x64xf32>
    %cst_58 = arith.constant dense<0.000000e+00> : vector<35xf32>
    %171 = vector.multi_reduction <add>, %170, %cst_58 [1] : vector<35x64xf32> to vector<35xf32>
    %172 = vector.shape_cast %171 : vector<35xf32> to vector<35x1xf32>
    %c5_59 = arith.constant 5 : index
    %c0_60 = arith.constant 0 : index
    %c0_61 = arith.constant 0 : index
    %173 = vector.load %arg4[%c5_59, %c0_60, %c0_61] : memref<6x35x64xf32, #tpu.memory_space<vmem>>, vector<1x35x64xf32>
    %174 = vector.shape_cast %173 : vector<1x35x64xf32> to vector<35x64xf32>
    %175 = arith.mulf %147, %174 : vector<35x64xf32>
    %cst_62 = arith.constant dense<0.000000e+00> : vector<35xf32>
    %176 = vector.multi_reduction <add>, %175, %cst_62 [1] : vector<35x64xf32> to vector<35xf32>
    %177 = vector.shape_cast %176 : vector<35xf32> to vector<35x1xf32>
    %178 = tpu.concatenate %152, %157, %162, %167, %172, %177 in 1 : vector<35x1xf32>, vector<35x1xf32>, vector<35x1xf32>, vector<35x1xf32>, vector<35x1xf32>, vector<35x1xf32> -> vector<35x6xf32>
    %cst_63 = arith.constant dense<0.000000e+00> : vector<6xf32>
    %179 = vector.multi_reduction <add>, %178, %cst_63 [0] : vector<35x6xf32> to vector<6xf32>
    %180 = vector.shape_cast %179 : vector<6xf32> to vector<1x6xf32>
    %181 = tpu.concatenate %144, %180 in 0 : vector<1x6xf32>, vector<1x6xf32> -> vector<2x6xf32>
    %c0_64 = arith.constant 0 : index
    %c0_65 = arith.constant 0 : index
    %182 = vector.load %arg5[%c0_64, %c0_65] : memref<1x6xf32, #tpu.memory_space<vmem>>, vector<1x6xf32>
    %183 = vector.broadcast %182 : vector<1x6xf32> to vector<2x6xf32>
    %184 = arith.addf %181, %183 : vector<2x6xf32>
    %cst_66 = arith.constant dense<0xFF800000> : vector<2xf32>
    %185 = vector.multi_reduction <maximumf>, %184, %cst_66 [1] : vector<2x6xf32> to vector<2xf32>
    %186 = vector.shape_cast %185 : vector<2xf32> to vector<2x1xf32>
    %187 = vector.broadcast %186 : vector<2x1xf32> to vector<2x6xf32>
    %188 = arith.subf %184, %187 : vector<2x6xf32>
    %189 = math.exp %188 : vector<2x6xf32>
    %cst_67 = arith.constant dense<0.000000e+00> : vector<2xf32>
    %190 = vector.multi_reduction <add>, %189, %cst_67 [1] : vector<2x6xf32> to vector<2xf32>
    %191 = vector.shape_cast %190 : vector<2xf32> to vector<2x1xf32>
    %192 = vector.broadcast %191 : vector<2x1xf32> to vector<2x6xf32>
    %193 = arith.divf %189, %192 : vector<2x6xf32>
    %c0_68 = arith.constant 0 : index
    %c0_69 = arith.constant 0 : index
    %194 = vector.load %arg6[%c0_68, %c0_69] : memref<2x6xf32, #tpu.memory_space<vmem>>, vector<2x6xf32>
    tpu.vector_store %arg6[%c0_68, %c0_69], %193 {strides = array<i32>} : memref<2x6xf32, #tpu.memory_space<vmem>>, vector<2x6xf32>,
    return
  }
  func.func @transform_0(%arg0: i32) -> (i32, i32) {
    %c0_i32 = arith.constant 0 : i32
    %c0_i32_0 = arith.constant 0 : i32
    %c0_i32_1 = arith.constant 0 : i32
    return %c0_i32, %c0_i32_0 : i32, i32
  }
  func.func @transform_1(%arg0: i32) -> (i32, i32) {
    %c0_i32 = arith.constant 0 : i32
    %c0_i32_0 = arith.constant 0 : i32
    %c0_i32_1 = arith.constant 0 : i32
    return %c0_i32, %c0_i32_0 : i32, i32
  }
  func.func @transform_2(%arg0: i32) -> (i32, i32) {
    %c0_i32 = arith.constant 0 : i32
    %c0_i32_0 = arith.constant 0 : i32
    %c0_i32_1 = arith.constant 0 : i32
    return %c0_i32, %c0_i32_0 : i32, i32
  }
  func.func @transform_3(%arg0: i32) -> (i32, i32, i32) {
    %c0_i32 = arith.constant 0 : i32
    %c0_i32_0 = arith.constant 0 : i32
    %c0_i32_1 = arith.constant 0 : i32
    %c0_i32_2 = arith.constant 0 : i32
    return %c0_i32, %c0_i32_0, %c0_i32_1 : i32, i32, i32
  }
  func.func @transform_4(%arg0: i32) -> (i32, i32) {
    %c0_i32 = arith.constant 0 : i32
    %c0_i32_0 = arith.constant 0 : i32
    %c0_i32_1 = arith.constant 0 : i32
    return %c0_i32, %c0_i32_0 : i32, i32
  }
  func.func @transform_5(%arg0: i32) -> (i32, i32) {
    %c0_i32 = arith.constant 0 : i32
    %c0_i32_0 = arith.constant 0 : i32
    %c0_i32_1 = arith.constant 0 : i32
    return %c0_i32, %c0_i32_0 : i32, i32
  }
}

</mosaic_0001>

<bundles_post_ra>
// kernel: tpu_custom_call.1
= control target key start
LH: loop header
LB: loop body
LE: loop exit
PB: predicated region body
PF: predicated region fallthrough
CT: control target
= control target key end

     0   :  { %10 = vsyncpa [#allocation3], 0  ;;  %s3005_s0 = inlined_call_operand.vmem [shape: s32[70,1], index: 0, kind: input, shape index: {}]   ;;  %s3006_s1 = inlined_call_operand.vmem [shape: bf16[100,192], index: 1, kind: input, shape index: {}]   ;;  %s3007_s2 = inlined_call_operand.hbm [shape: bf16[65,192], index: 2, kind: input, shape index: {}]   ;;  %s3008_s3 = inlined_call_operand.vmem [shape: f32[6,35,64], index: 3, kind: input, shape index: {}]   ;;  %s3009_s4 = inlined_call_operand.vmem [shape: f32[1,6], index: 4, kind: input, shape index: {}]   ;;  %s3010_s5 = inlined_call_operand.hbm [shape: f32[2,6], index: 5, kind: output, shape index: {}]  }
   0x1   :  { %11 = vsyncpa [#allocation4], 0  ;;  %s2069_s18 = smov [#allocation2]  }
   0x2   :  { %s21_s19 = sshll.u32 %s2069_s18, 4  ;;  %s22_s19 = int_to_ptr.vmem [resolvable:$true] %s21_s19 }
   0x3   :  { %s2033_s20 = scalar_lea.vmem %s22_s19, 1152  ;;  %p2038_p1 = scmp.lt.s32.totalorder %s22_s19, %s22_s19 }
   0x4   :  { %p2034_p0 = scmp.ne.s32.totalorder %s22_s19, %s2033_s20  ;;  %p2039_p2 = scmp.lt.s32.totalorder %s2033_s20, %s2033_s20 }
   0x6   :  { %p2040_p3 = por %p2039_p2, %p2038_p1 }
   0x8   :  { %p2041_p4 = pnand %p2040_p3, %p2034_p0 }
   0xa   :  { %2044 = shalt.err (!%p2041_p4)
}
   0xb   :  { %s2070_s21 = smov 128   ;;  %s2071_s22 = smov 8  }
   0xc   :  { %27 = dma.hbm_to_vmem [thread:$0]  %s3007_s2, 1152, %s22_s19, [#allocation3], %s2070_s21, %s2070_s21, %s2071_s22  }
   0xd   :  { %2065 = dma.done.wait [#allocation3], 1152  }
   0xe   :  { %2066 = vsyncadd [#allocation3], 4294966144  ;;  %v2072_v0 = vmov 0   ;;  %v39_v1 = vld [vmem:[%s3005_s0 + $0x10] sm:$0xff]  ;;  %v37_v2 = vld [vmem:[%s3005_s0] sm:$0xff]  ;;  %vm210_vm0 = vcmask 1041408   ;;  %v68_v24 = vlaneseq }
   0xf   :  { %1830 = vset.pattern.permute.xlu1 %v2072_v0  ;;  %1829 = vset.pattern.permute.xlu0 %v2072_v0  ;;  %v40_v3 = vld [vmem:[%s3005_s0 + $0x18] sm:$0xff]  ;;  %v38_v4 = vld [vmem:[%s3005_s0 + $0x8] sm:$0xff]  ;;  %v58_v5 = vld [vmem:[%s3006_s1 + $0x60] sm:$0x33]  ;;  %s2073_s16 = smov 64   ;;  %v2074_v38 = vmov 0.0  }
  0x10   :  { %249 = vmatprep.mubr.bf16.mxu0 %v2072_v0  ;;  %720 = vmatprep.mubr.bf16.mxu1 %v2072_v0  ;;  %v1745_v6 = vcombine.high %v58_v5, %v58_v5  ;;  %v1744_v7 = vcombine.low %v58_v5, %v58_v5  ;;  %v1833_v8 = vld [vmem:[%s3006_s1 + $0x54] ss:$8 sps:$4 sm:$0xff]   ;;  %v42_v9 = vld [vmem:[%s3005_s0 + $0x28] sm:$0xff]  ;;  %v41_v10 = vld [vmem:[%s3005_s0 + $0x20] sm:$0xff]  ;;  %v301_v26 = vshrl.u32 %v68_v24, 7  ;;  %v69_v34 = vand.u32 127, %v68_v24 }
  0x11   :  { %77 = vperm.xlu1 %1830, %v39_v1   ;;  %71 = vperm.xlu0 %1829, %v37_v2   ;;  %v1835_v12 = vld [vmem:[%s3006_s1 + $0x50] ss:$8 sps:$4 sm:$0xff]   ;;  %v1836_v13 = vld [vmem:[%s3006_s1 + $0x44] ss:$8 sps:$4 sm:$0xff]   ;;  %v1838_v16 = vld [vmem:[%s3006_s1 + $0x40] ss:$8 sps:$4 sm:$0xff]  }
  0x12   :  { %1746 = vmatprep.subr.msk.bf16.mxu0 %vm210_vm0, %v1745_v6  ;;  %v212_v11 = vsel %vm210_vm0, %v1744_v7, 0  ;;  %v44_v14 = vld [vmem:[%s3005_s0 + $0x38] sm:$0xff]  ;;  %v43_v15 = vld [vmem:[%s3005_s0 + $0x30] sm:$0xff]  ;;  %v45_v18 = vld [vmem:[%s3005_s0 + $0x40] sm:$0x3f]  ;;  %v302_v30 = vsub.s32 0, %v301_v26 }
  0x13   :  { %220 = vmatpush1.bf16.msra.mxu0 %v212_v11  ;;  %v1839_v17 = vld [vmem:[%s3006_s1 + $0x34] ss:$8 sps:$4 sm:$0xff]   ;;  %v1841_v19 = vld [vmem:[%s3006_s1 + $0x30] ss:$8 sps:$4 sm:$0xff]   ;;  %v1842_v20 = vld [vmem:[%s3006_s1 + $0x24] ss:$8 sps:$4 sm:$0xff]  }
  0x14   :  { %221 = vmatprep.subr.bf16.mxu0 %v1833_v8  ;;  %v1844_v21 = vld [vmem:[%s3006_s1 + $0x20] ss:$8 sps:$4 sm:$0xff]   ;;  %v1845_v22 = vld [vmem:[%s3006_s1 + $0x14] ss:$8 sps:$4 sm:$0xff]   ;;  %v1847_v23 = vld [vmem:[%s3006_s1 + $0x10] ss:$8 sps:$4 sm:$0xff]  }
  0x15   :  { %80 = vperm.xlu1 %1830, %v40_v3   ;;  %74 = vperm.xlu0 %1829, %v38_v4   ;;  %v1848_v25 = vld [vmem:[%s3006_s1 + $0x4] ss:$8 sps:$4 sm:$0xff]   ;;  %v1850_v28 = vld [vmem:[%s3006_s1] ss:$8 sps:$4 sm:$0xff]   ;;  %vm194_vm3 = vcmask 818176   ;;  %s2075_s1 = smov 96  }
  0x16   :  { %v2178_v27 = vld [vmem:[#allocation2 + $0x40] sm:$0x11]  ;;  %vm679_vm11 = vcmask 1040384   ;;  %vm579_vm12 = vsmask.f32 6400  ;;  %s2076_s17 = smov 32  }
  0x17   :  { %222 = vmatpush1.bf16.msra.mxu0 %v1835_v12  ;;  %v298_v29 = vunpack.c.l.bf16 %v2178_v27  ;;  %v299_v32 = vunpack.c.h.bf16 %v2178_v27  ;;  %vm612_vm13 = vcmask 261120   ;;  %vm622_vm14 = vcmask 523264   ;;  %s2077_s23 = smov [#allocation5]  }
  0x18   :  { %223 = vmatprep.subr.bf16.mxu0 %v1836_v13  ;;  %vm672_vm15 = vcmask 531456   ;;  %vm754_vm0 = vcmask 1042432   ;;  %s1714_s24 = sshll.u32 %s2077_s23, 4  ;;  %s1715_s24 = int_to_ptr.vmem [resolvable:$true] %s1714_s24 }
  0x19   :  { %86 = vperm.xlu1 %1830, %v42_v9   ;;  %83 = vperm.xlu0 %1829, %v41_v10   ;;  %v2184_v31 = vrot.slane %v298_v29, %v302_v30  ;;  %v2189_v33 = vrot.slane %v299_v32, %v302_v30  ;;  %p2050_p6 = scmp.lt.s32.totalorder %s1715_s24, %s1715_s24 }
  0x1b   :  { %224 = vmatpush1.bf16.msra.mxu0 %v1838_v16 }
  0x1c   :  { %225 = vmatprep.subr.bf16.mxu0 %v1839_v17 }
  0x1d   :  { %92 = vperm.xlu1 %1830, %v44_v14   ;;  %89 = vperm.xlu0 %1829, %v43_v15  }
  0x1f   :  { %226 = vmatpush1.bf16.msra.mxu0 %v1841_v19 }
  0x20   :  { %227 = vmatprep.subr.bf16.mxu0 %v1842_v20 }
  0x21   :  { %95 = vperm.xlu0 %1829, %v45_v18   ;;  %486 = vrot.lane.b32.xlu1 %v2189_v33, %s2073_s16 }
  0x23   :  { %228 = vmatpush1.bf16.msra.mxu0 %v1844_v21 }
  0x24   :  { %229 = vmatprep.subr.bf16.mxu0 %v1845_v22 }
  0x25   :  { %340 = vrot.lane.b32.xlu0 %v2184_v31, %s2073_s16 }
  0x27   :  { %230 = vmatpush1.bf16.msra.mxu0 %v1847_v23 }
  0x28   :  { %231 = vmatprep.subr.bf16.mxu0 %v1848_v25 }
  0x2b   :  { %232 = vmatpush1.bf16.msra.mxu0 %v1850_v28 }
  0x8c   :  { %v72_v35 = vpop.permute.xlu0 %71  ;;  %v78_v36 = vpop.permute.xlu1 %77 }
  0x8d   :  { %vm97_vm1 = vcmp.eq.s32.totalorder %v69_v34, %v72_v35  ;;  %vm99_vm4 = vcmp.eq.s32.totalorder %v69_v34, %v78_v36 }
  0x8e   :  { %v1723_v39 = vsel %vm97_vm1, 1.0, %v2074_v38  ;;  %v1725_v43 = vsel %vm99_vm4, 1.0, %v2074_v38  ;;  %vm1073_vm1 = vcmask 1044480   ;;  %vm1428_vm4 = vcmask 521216  }
  0x90   :  { %v75_v37 = vpop.permute.xlu0 %74  ;;  %v81_v42 = vpop.permute.xlu1 %80 }
  0x91   :  { %vm98_vm2 = vcmp.eq.s32.totalorder %v69_v34, %v75_v37  ;;  %vm100_vm5 = vcmp.eq.s32.totalorder %v69_v34, %v81_v42 }
  0x92   :  { %v1724_v40 = vsel %vm98_vm2, 1.0, %v2074_v38  ;;  %v1726_v44 = vsel %vm100_vm5, 1.0, %v2074_v38  ;;  %vm1415_vm2 = vcmask 523267   ;;  %vm1299_vm5 = vcmask 7168  }
  0x93   :  { %v124_v41 = vpack.c.bf16 %v1724_v40, %v1723_v39  ;;  %v125_v47 = vpack.c.bf16 %v1726_v44, %v1725_v43 }
  0x94   :  { %v87_v45 = vpop.permute.xlu1 %86  ;;  %v84_v46 = vpop.permute.xlu0 %83 }
  0x95   :  { %1747 = vmatmul.mubr.msk.bf16.vlgmr.msra.gmra.mxu0 %vm194_vm3, %v124_v41  ;;  %vm102_vm6 = vcmp.eq.s32.totalorder %v69_v34, %v87_v45  ;;  %vm101_vm7 = vcmp.eq.s32.totalorder %v69_v34, %v84_v46 }
  0x96   :  { %259 = vmatprep.mubr.bf16.mxu0 %v2072_v0  ;;  %v1728_v48 = vsel %vm102_vm6, 1.0, %v2074_v38  ;;  %v1727_v49 = vsel %vm101_vm7, 1.0, %v2074_v38  ;;  %vm1305_vm6 = vcmask 15360   ;;  %vm1311_vm7 = vcmask 23552  }
  0x97   :  { %v126_v52 = vpack.c.bf16 %v1728_v48, %v1727_v49 }
  0x98   :  { %v93_v50 = vpop.permute.xlu1 %92  ;;  %v90_v51 = vpop.permute.xlu0 %89 }
  0x99   :  { %vm104_vm8 = vcmp.eq.s32.totalorder %v69_v34, %v93_v50  ;;  %vm103_vm9 = vcmp.eq.s32.totalorder %v69_v34, %v90_v51 }
  0x9a   :  { %v1730_v53 = vsel %vm104_vm8, 1.0, %v2074_v38  ;;  %v1729_v54 = vsel %vm103_vm9, 1.0, %v2074_v38  ;;  %vm1317_vm8 = vcmask 31744   ;;  %vm1323_vm9 = vcmask 39936  }
  0x9b   :  { %v127_v56 = vpack.c.bf16 %v1730_v53, %v1729_v54 }
  0x9c   :  { %v96_v55 = vpop.permute.xlu0 %95  ;;  %v487_v50 = vpop.permute.xlu1 %486 }
  0x9d   :  { %1748 = vmatmul.mubr.msk.bf16.gmra.mxu0 %vm194_vm3, %v125_v47  ;;  %vm105_vm10 = vcmp.eq.s32.totalorder %v69_v34, %v96_v55 }
  0x9e   :  { %269 = vmatprep.mubr.bf16.mxu0 %v2072_v0  ;;  %v1731_v57 = vsel %vm105_vm10, 1.0, %v2074_v38  ;;  %vm1329_vm10 = vcmask 48128  }
  0x9f   :  { %v128_v58 = vpack.c.bf16 %v1731_v57, %v1731_v57 }
  0xa5   :  { %1749 = vmatmul.mubr.msk.bf16.gmra.mxu0 %vm194_vm3, %v126_v52 }
  0xa6   :  { %279 = vmatprep.mubr.bf16.mxu0 %v2072_v0 }
  0xad   :  { %1750 = vmatmul.mubr.msk.bf16.gmra.mxu0 %vm194_vm3, %v127_v56 }
  0xae   :  { %289 = vmatprep.mubr.bf16.mxu0 %v2072_v0 }
  0xb5   :  { %1751 = vmatmul.mubr.msk.bf16.gmra.mxu0 %vm194_vm3, %v128_v58  ;;  %vm1165_vm3 = vcmask 518144  }
 0x155   :  { %v2202_v59 = vpop.f32.mrf.mxu0 }
 0x156   :  { %v304_v8 = vadd.f32 %v2184_v31, %v2202_v59 }
 0x157   :  { %v2204_v60 = vpop.f32.mrf.mxu0 }
 0x158   :  { %v1752_v13 = vmul.f32 -1.442695, %v304_v8 }
 0x159   :  { %v2206_v61 = vpop.f32.mrf.mxu0 }
 0x15a   :  { %v305_v14 = vadd.f32 %v2184_v31, %v2206_v61 }
 0x15b   :  { %v2208_v62 = vpop.f32.mrf.mxu0 }
 0x15c   :  { %v1753_v20 = vmul.f32 -1.442695, %v305_v14 }
 0x15d   :  { %v2210_v63 = vpop.f32.mrf.mxu0 }
 0x15e   :  { %v306_v18 = vadd.f32 %v2184_v31, %v2210_v63 }
 0x15f   :  { %v2212_v1 = vpop.f32.mrf.mxu0 }
 0x160   :  { %v1754_v25 = vmul.f32 -1.442695, %v306_v18 }
 0x161   :  { %v2214_v2 = vpop.f32.mrf.mxu0 }
 0x162   :  { %v307_v21 = vadd.f32 %v2184_v31, %v2214_v2 }
 0x163   :  { %v2216_v3 = vpop.f32.mrf.mxu0 }
 0x164   :  { %v1755_v28 = vmul.f32 -1.442695, %v307_v21 }
 0x165   :  { %v2218_v4 = vpop.f32.mrf.mxu0 }
 0x166   :  { %v308_v5 = vadd.f32 %v2184_v31, %v2218_v4 }
 0x167   :  { %v2222_v6 = vpop.f32.mrf.mxu0 }
 0x168   :  { %v1756_v7 = vmul.f32 -1.442695, %v308_v5 }
 0x169   :  { %v2226_v9 = vpop.f32.mrf.mxu0 }
 0x16a   :  { %v423_v10 = vadd.f32 %v2184_v31, %v2226_v9  ;;  %1865 = vpow2.f32 %v1756_v7 }
 0x16b   :  { %v2230_v11 = vpop.f32.mrf.mxu0 }
 0x16c   :  { %v1758_v12 = vmul.f32 -1.442695, %v423_v10  ;;  %v341_v10 = vpop.permute.xlu0 %340 }
 0x16d   :  { %v2234_v15 = vpop.f32.mrf.mxu0 }
 0x16e   :  { %v425_v16 = vadd.f32 %v2184_v31, %v2234_v15  ;;  %1867 = vpow2.f32 %v1758_v12 }
 0x16f   :  { %v2238_v17 = vpop.f32.mrf.mxu0  ;;  %1869 = vpow2.f32 %v1752_v13 }
 0x170   :  { %v1760_v19 = vmul.f32 -1.442695, %v425_v16 }
 0x171   :  { %v2244_v22 = vpop.f32.mrf.mxu0 }
 0x172   :  { %v427_v23 = vadd.f32 %v2184_v31, %v2244_v22  ;;  %1871 = vpow2.f32 %v1760_v19 }
 0x173   :  { %v2248_v24 = vpop.f32.mrf.mxu0  ;;  %1873 = vpow2.f32 %v1753_v20 }
 0x174   :  { %v1762_v26 = vmul.f32 -1.442695, %v427_v23 }
 0x175   :  { %v2250_v29 = vpop.f32.mrf.mxu0 }
 0x176   :  { %v429_v30 = vadd.f32 %v2184_v31, %v2250_v29  ;;  %1875 = vpow2.f32 %v1762_v26 }
 0x177   :  { %v2254_v32 = vpop.f32.mrf.mxu0  ;;  %v1866_v34 = vpop.eup %1865  ;;  %1877 = vpow2.f32 %v1754_v25 }
 0x178   :  { %v1764_v35 = vmul.f32 -1.442695, %v429_v30  ;;  %1879 = vpow2.f32 %v1755_v28  ;;  %v328_v36 = vadd.f32 1.0, %v1866_v34 }
 0x179   :  { %v295_v37 = vpop.f32.mrf.mxu0 }
 0x17a   :  { %1881 = vpow2.f32 %v1764_v35 }
 0x17b   :  { %1883 = vrcp.f32 %v328_v36  ;;  %v296_v38 = vpop.f32.mrf.mxu0  ;;  %v1868_v39 = vpop.eup %1867 }
 0x17c   :  { %v459_v40 = vadd.f32 1.0, %v1868_v39  ;;  %v1870_v41 = vpop.eup %1869 }
 0x17d   :  { %v324_v43 = vadd.f32 1.0, %v1870_v41 }
 0x17e   :  { %1885 = vrcp.f32 %v459_v40 }
 0x17f   :  { %v1872_v42 = vpop.eup %1871 }
 0x180   :  { %v461_v44 = vadd.f32 1.0, %v1872_v42  ;;  %v1874_v31 = vpop.eup %1873 }
 0x181   :  { %v325_v47 = vadd.f32 1.0, %v1874_v31 }
 0x182   :  { %1887 = vrcp.f32 %v461_v44 }
 0x183   :  { %v1876_v45 = vpop.eup %1875  ;;  %1889 = vrcp.f32 %v324_v43 }
 0x184   :  { %v1878_v46 = vpop.eup %1877  ;;  %v463_v48 = vadd.f32 1.0, %v1876_v45 }
 0x185   :  { %v1880_v49 = vpop.eup %1879  ;;  %v326_v53 = vadd.f32 1.0, %v1878_v46 }
 0x186   :  { %1891 = vrcp.f32 %v463_v48  ;;  %v327_v55 = vadd.f32 1.0, %v1880_v49 }
 0x187   :  { %v1882_v51 = vpop.eup %1881  ;;  %1893 = vrcp.f32 %v325_v47 }
 0x188   :  { %v2256_v52 = vpop.eup %1883  ;;  %v465_v54 = vadd.f32 1.0, %v1882_v51 }
 0x189   :  { %v489_v56 = vmul.f32 %v2256_v52, %v487_v50  ;;  %v347_v28 = vmul.f32 %v2256_v52, %v341_v10 }
 0x18a   :  { %1895 = vrcp.f32 %v465_v54 }
 0x18b   :  { %499 = vrot.lane.b32.xlu1 %v489_v56, %s2073_s16  ;;  %v1886_v57 = vpop.eup %1885  ;;  %1897 = vrcp.f32 %v326_v53 }
 0x18c   :  { %1899 = vrcp.f32 %v327_v55  ;;  %v490_v58 = vmul.f32 %v1886_v57, %v487_v50 }
 0x18e   :  { %501 = vrot.lane.b32.xlu0 %v490_v58, %s2073_s16 }
 0x18f   :  { %v1888_v5 = vpop.eup %1887 }
 0x190   :  { %v491_v7 = vmul.f32 %v1888_v5, %v487_v50  ;;  %v2261_v8 = vpop.eup %1889 }
 0x191   :  { %v343_v14 = vmul.f32 %v2261_v8, %v341_v10 }
 0x192   :  { %503 = vrot.lane.b32.xlu1 %v491_v7, %s2073_s16 }
 0x193   :  { %v1892_v12 = vpop.eup %1891 }
 0x194   :  { %v492_v13 = vmul.f32 %v1892_v12, %v487_v50  ;;  %v2265_v16 = vpop.eup %1893  ;;  %v1775_v12 = vcombine.high %v2178_v27, %v2178_v27 }
 0x195   :  { %v344_v21 = vmul.f32 %v2265_v16, %v341_v10 }
 0x196   :  { %505 = vrot.lane.b32.xlu0 %v492_v13, %s2073_s16  ;;  %353 = vrot.lane.b32.xlu1 %v343_v14, %s2073_s16  ;;  %v1774_v13 = vcombine.low %v2178_v27, %v2178_v27  ;;  %v1861_v27 = vld [vmem:[#allocation2 + $0x10] ss:$8 sps:$4 sm:$0xff]  }
 0x197   :  { %v1896_v18 = vpop.eup %1895 }
 0x198   :  { %v493_v19 = vmul.f32 %v1896_v18, %v487_v50  ;;  %v2269_v20 = vpop.eup %1897  ;;  %v681_v18 = vsel %vm679_vm11, 65535, %v2072_v0 }
 0x199   :  { %v2272_v23 = vpop.eup %1899  ;;  %v345_v25 = vmul.f32 %v2269_v20, %v341_v10 }
 0x19a   :  { %355 = vrot.lane.b32.xlu0 %v344_v21, %s2073_s16  ;;  %507 = vrot.lane.b32.xlu1 %v493_v19, %s2073_s16  ;;  %v346_v26 = vmul.f32 %v2272_v23, %v341_v10  ;;  %v686_v19 = vand.u32 %v1775_v12, %v681_v18  ;;  %v683_v21 = vand.u32 %v1774_v13, %v681_v18  ;;  %v1862_v18 = vld [vmem:[#allocation2 + $0x4] ss:$8 sps:$4 sm:$0xff]  }
 0x19c   :  { %694 = vmatprep.subr.bf16.mxu1 %v686_v19  ;;  %v1864_v19 = vld [vmem:[#allocation2] ss:$8 sps:$4 sm:$0xff]  }
 0x19d   :  { %695 = vmatpush1.bf16.msra.mxu1 %v683_v21 }
 0x19e   :  { %357 = vrot.lane.b32.xlu0 %v345_v25, %s2073_s16  ;;  %359 = vrot.lane.b32.xlu1 %v346_v26, %s2073_s16  ;;  %v1853_v25 = vld [vmem:[#allocation2 + $0x34] ss:$8 sps:$4 sm:$0xff]   ;;  %v1855_v26 = vld [vmem:[#allocation2 + $0x30] ss:$8 sps:$4 sm:$0xff]  }
 0x19f   :  { %696 = vmatprep.subr.bf16.mxu1 %v1853_v25 }
 0x1a1   :  { %697 = vmatpush1.bf16.msra.mxu1 %v1855_v26 }
 0x1a2   :  { %361 = vrot.lane.b32.xlu0 %v347_v28, %s2073_s16  ;;  %v1856_v28 = vld [vmem:[#allocation2 + $0x24] ss:$8 sps:$4 sm:$0xff]  }
 0x1a3   :  { %698 = vmatprep.subr.bf16.mxu1 %v1856_v28 }
 0x1fd   :  { %v500_v30 = vpop.permute.xlu1 %499 }
 0x1fe   :  { %v514_v34 = vadd.f32 %v500_v30, %v2222_v6  ;;  %v1858_v30 = vld [vmem:[#allocation2 + $0x20] ss:$8 sps:$4 sm:$0xff]  }
 0x1ff   :  { %699 = vmatpush1.bf16.msra.mxu1 %v1858_v30 }
 0x200   :  { %1901 = vtanh.f32 %v514_v34  ;;  %v502_v35 = vpop.permute.xlu0 %501  ;;  %v1859_v34 = vld [vmem:[#allocation2 + $0x14] ss:$8 sps:$4 sm:$0xff]  }
 0x201   :  { %v515_v36 = vadd.f32 %v502_v35, %v2230_v11  ;;  %700 = vmatprep.subr.bf16.mxu1 %v1859_v34  ;;  %v424_v35 = vadd.f32 %v2189_v33, %v2230_v11 }
 0x203   :  { %1903 = vtanh.f32 %v515_v36  ;;  %701 = vmatpush1.bf16.msra.mxu1 %v1861_v27  ;;  %v422_v36 = vadd.f32 %v2189_v33, %v2222_v6 }
 0x204   :  { %v504_v37 = vpop.permute.xlu1 %503  ;;  %702 = vmatprep.subr.bf16.mxu1 %v1862_v18 }
 0x205   :  { %v516_v38 = vadd.f32 %v504_v37, %v2238_v17  ;;  %v1759_v37 = vmul.f32 -1.442695, %v424_v35 }
 0x207   :  { %1905 = vtanh.f32 %v516_v38  ;;  %v1757_v38 = vmul.f32 -1.442695, %v422_v36  ;;  %703 = vmatpush1.bf16.msra.mxu1 %v1864_v19  ;;  %v378_v36 = vsub.f32 1.0, %v2261_v8 }
 0x208   :  { %v354_v39 = vpop.permute.xlu1 %353  ;;  %v506_v40 = vpop.permute.xlu0 %505 }
 0x209   :  { %v368_v41 = vadd.f32 %v354_v39, %v2202_v59  ;;  %v517_v42 = vadd.f32 %v506_v40, %v2248_v24  ;;  %v426_v39 = vadd.f32 %v2189_v33, %v2238_v17  ;;  %v428_v40 = vadd.f32 %v2189_v33, %v2248_v24 }
 0x20b   :  { %1907 = vtanh.f32 %v368_v41  ;;  %v1761_v41 = vmul.f32 -1.442695, %v426_v39 }
 0x20c   :  { %1909 = vtanh.f32 %v517_v42  ;;  %v508_v44 = vpop.permute.xlu1 %507  ;;  %v356_v31 = vpop.permute.xlu0 %355  ;;  %v430_v42 = vadd.f32 %v2189_v33, %v2254_v32 }
 0x20d   :  { %v1902_v43 = vpop.eup %1901  ;;  %v518_v45 = vadd.f32 %v508_v44, %v2254_v32  ;;  %v369_v46 = vadd.f32 %v356_v31, %v2206_v61 }
 0x20e   :  { %534 = vrot.lane.b32.xlu1 %v1902_v43, %s2075_s1  ;;  %v1763_v43 = vmul.f32 -1.442695, %v428_v40  ;;  %v1765_v11 = vmul.f32 -1.442695, %v430_v42 }
 0x20f   :  { %1911 = vtanh.f32 %v518_v45 }
 0x210   :  { %v1904_v47 = vpop.eup %1903  ;;  %1913 = vtanh.f32 %v369_v46  ;;  %v360_v48 = vpop.permute.xlu1 %359 }
 0x211   :  { %v358_v49 = vpop.permute.xlu0 %357  ;;  %v371_v50 = vadd.f32 %v360_v48, %v2214_v2  ;;  %536 = vrot.lane.b32.xlu0 %v1904_v47, %s2075_s1 }
 0x212   :  { %v370_v51 = vadd.f32 %v358_v49, %v2210_v63 }
 0x213   :  { %1915 = vtanh.f32 %v371_v50 }
 0x214   :  { %v1906_v53 = vpop.eup %1905  ;;  %1917 = vtanh.f32 %v370_v51 }
 0x215   :  { %v362_v54 = vpop.permute.xlu0 %361  ;;  %538 = vrot.lane.b32.xlu1 %v1906_v53, %s2075_s1 }
 0x216   :  { %v372_v55 = vadd.f32 %v362_v54, %v2218_v4 }
 0x218   :  { %1919 = vtanh.f32 %v372_v55  ;;  %v1908_v56 = vpop.eup %1907 }
 0x219   :  { %v1910_v57 = vpop.eup %1909  ;;  %388 = vrot.lane.b32.xlu1 %v1908_v56, %s2075_s1  ;;  %1921 = vpow2.f32 %v1759_v37 }
 0x21a   :  { %540 = vrot.lane.b32.xlu0 %v1910_v57, %s2075_s1  ;;  %1923 = vpow2.f32 %v1757_v38 }
 0x21b   :  { %1925 = vpow2.f32 %v1761_v41 }
 0x21c   :  { %v1912_v58 = vpop.eup %1911  ;;  %1927 = vpow2.f32 %v1763_v43 }
 0x21d   :  { %v1914_v5 = vpop.eup %1913  ;;  %542 = vrot.lane.b32.xlu1 %v1912_v58, %s2075_s1  ;;  %1929 = vpow2.f32 %v1765_v11  ;;  %v379_v11 = vsub.f32 1.0, %v2265_v16 }
 0x21e   :  { %390 = vrot.lane.b32.xlu0 %v1914_v5, %s2075_s1 }
 0x220   :  { %v1916_v7 = vpop.eup %1915 }
 0x221   :  { %v1918_v10 = vpop.eup %1917  ;;  %394 = vrot.lane.b32.xlu1 %v1916_v7, %s2075_s1 }
 0x222   :  { %392 = vrot.lane.b32.xlu0 %v1918_v10, %s2075_s1 }
 0x225   :  { %v1920_v14 = vpop.eup %1919 }
 0x226   :  { %396 = vrot.lane.b32.xlu0 %v1920_v14, %s2075_s1  ;;  %v1922_v44 = vpop.eup %1921 }
 0x227   :  { %v1924_v31 = vpop.eup %1923  ;;  %v460_v45 = vadd.f32 1.0, %v1922_v44 }
 0x228   :  { %v458_v46 = vadd.f32 1.0, %v1924_v31  ;;  %v1926_v47 = vpop.eup %1925 }
 0x229   :  { %1931 = vrcp.f32 %v460_v45  ;;  %v1928_v17 = vpop.eup %1927  ;;  %v462_v48 = vadd.f32 1.0, %v1926_v47 }
 0x22a   :  { %1933 = vrcp.f32 %v458_v46  ;;  %v1930_v24 = vpop.eup %1929  ;;  %v464_v49 = vadd.f32 1.0, %v1928_v17  ;;  %v408_v17 = vmul.f32 0.0, %v2261_v8 }
 0x22b   :  { %1935 = vrcp.f32 %v462_v48  ;;  %v466_v50 = vadd.f32 1.0, %v1930_v24  ;;  %v409_v24 = vmul.f32 0.0, %v2265_v16 }
 0x22c   :  { %1937 = vrcp.f32 %v464_v49 }
 0x22d   :  { %1939 = vrcp.f32 %v466_v50 }
 0x236   :  { %v1932_v33 = vpop.eup %1931 }
 0x237   :  { %v1934_v32 = vpop.eup %1933  ;;  %v525_v51 = vsub.f32 1.0, %v1932_v33  ;;  %v555_v5 = vmul.f32 0.0, %v1932_v33  ;;  %v381_v33 = vsub.f32 1.0, %v2272_v23 }
 0x238   :  { %v524_v55 = vsub.f32 1.0, %v1934_v32  ;;  %v1936_v57 = vpop.eup %1935  ;;  %v554_v12 = vmul.f32 0.0, %v1934_v32  ;;  %v411_v32 = vmul.f32 0.0, %v2272_v23 }
 0x239   :  { %v1938_v10 = vpop.eup %1937  ;;  %v526_v14 = vsub.f32 1.0, %v1936_v57  ;;  %v556_v35 = vmul.f32 0.0, %v1936_v57 }
 0x23a   :  { %v1940_v25 = vpop.eup %1939  ;;  %v527_v30 = vsub.f32 1.0, %v1938_v10  ;;  %v557_v37 = vmul.f32 0.0, %v1938_v10  ;;  %v410_v10 = vmul.f32 0.0, %v2269_v20 }
 0x23b   :  { %v528_v39 = vsub.f32 1.0, %v1940_v25  ;;  %v558_v44 = vmul.f32 0.0, %v1940_v25 }
 0x280   :  { %v535_v53 = vpop.permute.xlu1 %534 }
 0x281   :  { %v549_v58 = vmul.f32 %v535_v53, %v524_v55 }
 0x283   :  { %v537_v54 = vpop.permute.xlu0 %536  ;;  %v2320_v21 = vadd.f32 %v554_v12, %v549_v58 }
 0x284   :  { %v550_v56 = vmul.f32 %v537_v54, %v525_v51  ;;  %v380_v51 = vsub.f32 1.0, %v2269_v20 }
 0x286   :  { %v2318_v13 = vadd.f32 %v555_v5, %v550_v56 }
 0x287   :  { %v539_v7 = vpop.permute.xlu1 %538 }
 0x288   :  { %v551_v26 = vmul.f32 %v539_v7, %v526_v14  ;;  %v567_v34 = vpack.c.bf16 %v2318_v13, %v2320_v21 }
 0x28a   :  { %v2325_v40 = vadd.f32 %v556_v35, %v551_v26  ;;  %v581_v46 = vshrl.u32 %v567_v34, 16  ;;  %v584_v47 = vshll.u32 %v567_v34, 16 }
 0x28b   :  { %v389_v28 = vpop.permute.xlu1 %388 }
 0x28c   :  { %v541_v27 = vpop.permute.xlu0 %540  ;;  %v403_v41 = vmul.f32 %v389_v28, %v378_v36  ;;  %v583_v5 = vrot.slane %v581_v46, 1  ;;  %v586_v7 = vrot.slane %v584_v47, 2 }
 0x28d   :  { %v552_v38 = vmul.f32 %v541_v27, %v527_v30  ;;  %v382_v30 = vsub.f32 1.0, %v2256_v52 }
 0x28e   :  { %v2339_v53 = vadd.f32 %v408_v17, %v403_v41  ;;  %v587_v27 = vor.u32 %v586_v7, %v583_v5 }
 0x28f   :  { %v2327_v42 = vadd.f32 %v557_v37, %v552_v38  ;;  %v543_v43 = vpop.permute.xlu1 %542  ;;  %v412_v37 = vmul.f32 0.0, %v2256_v52 }
 0x290   :  { %v553_v31 = vmul.f32 %v543_v43, %v528_v39  ;;  %v391_v45 = vpop.permute.xlu0 %390 }
 0x291   :  { %v568_v48 = vpack.c.bf16 %v2327_v42, %v2325_v40  ;;  %v404_v49 = vmul.f32 %v391_v45, %v379_v11 }
 0x292   :  { %v2334_v50 = vadd.f32 %v558_v44, %v553_v31 }
 0x293   :  { %v2341_v54 = vadd.f32 %v409_v24, %v404_v49  ;;  %v395_v55 = vpop.permute.xlu1 %394  ;;  %v589_v8 = vshrl.u32 %v568_v48, 16  ;;  %v592_v56 = vshll.u32 %v568_v48, 16 }
 0x294   :  { %v569_v57 = vpack.c.bf16 %v2334_v50, %v2334_v50  ;;  %v406_v16 = vmul.f32 %v395_v55, %v381_v33  ;;  %v393_v58 = vpop.permute.xlu0 %392 }
 0x295   :  { %v405_v12 = vmul.f32 %v393_v58, %v380_v51  ;;  %v564_v23 = vpack.c.bf16 %v2341_v54, %v2339_v53  ;;  %v591_v14 = vrot.slane %v589_v8, 1  ;;  %v594_v19 = vrot.slane %v592_v56, 2 }
 0x296   :  { %v2348_v18 = vadd.f32 %v411_v32, %v406_v16  ;;  %v598_v25 = vshrl.u32 %v569_v57, 16  ;;  %v601_v26 = vshll.u32 %v569_v57, 16 }
 0x297   :  { %v2350_v28 = vadd.f32 %v410_v10, %v405_v12  ;;  %573 = vrot.lane.b32.xlu1 %v564_v23, %s2075_s1  ;;  %v595_v20 = vor.u32 %v594_v19, %v591_v14 }
 0x298   :  { %v397_v34 = vpop.permute.xlu0 %396  ;;  %v600_v35 = vrot.slane %v598_v25, 1  ;;  %v603_v36 = vrot.slane %v601_v26, 2 }
 0x299   :  { %v407_v38 = vmul.f32 %v397_v34, %v382_v30  ;;  %v565_v39 = vpack.c.bf16 %v2348_v18, %v2350_v28  ;;  %v596_v41 = vsel %vm579_vm12, %v587_v27, %v595_v20 }
 0x29a   :  { %v604_v43 = vor.u32 %v603_v36, %v600_v35  ;;  %606 = vrot.lane.b32.xlu0 %v596_v41, %s2076_s17 }
 0x29b   :  { %v2357_v11 = vadd.f32 %v412_v37, %v407_v38  ;;  %575 = vrot.lane.b32.xlu1 %v565_v39, %s2075_s1 }
 0x29c   :  { %v605_v44 = vsel %vm579_vm12, %v595_v20, %v604_v43  ;;  %vm1337_vm12 = vcmask 43008  }
 0x29d   :  { %v566_v31 = vpack.c.bf16 %v2357_v11, %v2357_v11 }
 0x29e   :  { %608 = vrot.lane.b32.xlu0 %v605_v44, %s2076_s17 }
 0x29f   :  { %577 = vrot.lane.b32.xlu1 %v566_v31, %s2075_s1 }
 0x2a2   :  { %610 = vrot.lane.b32.xlu0 %v604_v43, %s2076_s17 }
 0x309   :  { %v574_v52 = vpop.permute.xlu1 %573 }
 0x30c   :  { %v607_v45 = vpop.permute.xlu0 %606 }
 0x30d   :  { %v615_v46 = vsel %vm612_vm13, %v574_v52, %v607_v45  ;;  %v576_v48 = vpop.permute.xlu1 %575 }
 0x30e   :  { %v624_v47 = vsel %vm622_vm14, %v615_v46, 1065369472 }
 0x30f   :  { %1776 = vmatmul.mubr.msk.bf16.vlgmr.msra.gmra.mxu1 %vm672_vm15, %v624_v47 }
 0x310   :  { %v609_v17 = vpop.permute.xlu0 %608  ;;  %730 = vmatprep.mubr.bf16.mxu1 %v2072_v0 }
 0x311   :  { %v618_v24 = vsel %vm612_vm13, %v576_v48, %v609_v17  ;;  %v578_v32 = vpop.permute.xlu1 %577 }
 0x312   :  { %v625_v49 = vsel %vm622_vm14, %v618_v24, 1065369472 }
 0x314   :  { %v611_v33 = vpop.permute.xlu0 %610 }
 0x315   :  { %v621_v51 = vsel %vm612_vm13, %v578_v32, %v611_v33 }
 0x316   :  { %v626_v55 = vsel %vm622_vm14, %v621_v51, 1065369472 }
 0x317   :  { %1777 = vmatmul.mubr.msk.bf16.gmra.mxu1 %vm672_vm15, %v625_v49 }
 0x318   :  { %740 = vmatprep.mubr.bf16.mxu1 %v2072_v0 }
 0x31f   :  { %1778 = vmatmul.mubr.msk.bf16.gmra.mxu1 %vm672_vm15, %v626_v55 }
 0x3cf   :  { %v722_v8 = vpop.f32.mrf.mxu1 }
 0x3d0   :  { %v755_v56 = vrot.slane %v722_v8, 5  ;;  %v913_v38 = vadd.f32 %v722_v8, %v2202_v59 }
 0x3d1   :  { %v2374_v57 = vpop.f32.mrf.mxu1 }
 0x3d2   :  { %804 = vrot.lane.b32.xlu1 %v755_v56, %s2073_s16  ;;  %v769_v37 = vadd.f32 %v755_v56, %v2218_v4  ;;  %v1784_v43 = vmul.f32 -1.442695, %v913_v38 }
 0x3d3   :  { %v726_v16 = vpop.f32.mrf.mxu1 }
 0x3d4   :  { %v756_v58 = vrot.slane %v726_v16, 5  ;;  %v1779_v39 = vmul.f32 -1.442695, %v769_v37  ;;  %v915_v41 = vadd.f32 %v726_v16, %v2206_v61 }
 0x3d5   :  { %v2377_v5 = vpop.f32.mrf.mxu1 }
 0x3d6   :  { %988 = vrot.lane.b32.xlu1 %v2374_v57, %s2073_s16  ;;  %990 = vrot.lane.b32.xlu0 %v2377_v5, %s2073_s16  ;;  %v757_v12 = vsel %vm754_vm0, %v755_v56, %v756_v58  ;;  %1941 = vpow2.f32 %v1779_v39  ;;  %v1786_v44 = vmul.f32 -1.442695, %v915_v41 }
 0x3d7   :  { %v732_v0 = vpop.f32.mrf.mxu1  ;;  %v770_v31 = vadd.f32 %v757_v12, %v2226_v9  ;;  %1943 = vpow2.f32 %v1784_v43 }
 0x3d8   :  { %v758_v7 = vrot.slane %v732_v0, 5  ;;  %1945 = vpow2.f32 %v1786_v44  ;;  %v917_v17 = vadd.f32 %v732_v0, %v2210_v63 }
 0x3d9   :  { %v2383_v10 = vpop.f32.mrf.mxu1  ;;  %v1780_v45 = vmul.f32 -1.442695, %v770_v31 }
 0x3da   :  { %806 = vrot.lane.b32.xlu0 %v757_v12, %s2073_s16  ;;  %v759_v23 = vsel %vm754_vm0, %v756_v58, %v758_v7  ;;  %v1788_v24 = vmul.f32 -1.442695, %v917_v17 }
 0x3db   :  { %808 = vrot.lane.b32.xlu1 %v759_v23, %s2073_s16  ;;  %v736_v14 = vpop.f32.mrf.mxu1  ;;  %v771_v52 = vadd.f32 %v759_v23, %v2234_v15  ;;  %1947 = vpow2.f32 %v1780_v45 }
 0x3dc   :  { %v760_v19 = vrot.slane %v736_v14, 5  ;;  %v919_v33 = vadd.f32 %v736_v14, %v2214_v2 }
 0x3dd   :  { %v2389_v25 = vpop.f32.mrf.mxu1  ;;  %v1781_v46 = vmul.f32 -1.442695, %v771_v52 }
 0x3de   :  { %v761_v26 = vsel %vm754_vm0, %v758_v7, %v760_v19  ;;  %v1790_v16 = vmul.f32 -1.442695, %v919_v33 }
 0x3df   :  { %810 = vrot.lane.b32.xlu0 %v761_v26, %s2073_s16  ;;  %v742_v30 = vpop.f32.mrf.mxu1  ;;  %v772_v47 = vadd.f32 %v761_v26, %v2244_v22  ;;  %1949 = vpow2.f32 %v1781_v46 }
 0x3e0   :  { %v762_v34 = vrot.slane %v742_v30, 5  ;;  %v921_v49 = vadd.f32 %v742_v30, %v2218_v4 }
 0x3e1   :  { %v2393_v27 = vpop.f32.mrf.mxu1  ;;  %v1782_v59 = vmul.f32 -1.442695, %v772_v47 }
 0x3e2   :  { %v763_v20 = vsel %vm754_vm0, %v760_v19, %v762_v34  ;;  %v1792_v56 = vmul.f32 -1.442695, %v921_v49 }
 0x3e3   :  { %992 = vrot.lane.b32.xlu0 %v2383_v10, %s2073_s16  ;;  %v746_v35 = vpop.f32.mrf.mxu1  ;;  %812 = vrot.lane.b32.xlu1 %v763_v20, %s2073_s16  ;;  %v773_v61 = vadd.f32 %v763_v20, %v2250_v29  ;;  %v1942_v48 = vpop.eup %1941  ;;  %1951 = vpow2.f32 %v1782_v59 }
 0x3e4   :  { %v1944_v51 = vpop.eup %1943  ;;  %v789_v55 = vadd.f32 1.0, %v1942_v48  ;;  %1953 = vpow2.f32 %v1788_v24 }
 0x3e5   :  { %v747_v36 = vpop.f32.mrf.mxu1  ;;  %v1783_v32 = vmul.f32 -1.442695, %v773_v61  ;;  %v1946_v8 = vpop.eup %1945  ;;  %v953_v63 = vadd.f32 1.0, %v1944_v51 }
 0x3e6   :  { %v955_v58 = vadd.f32 1.0, %v1946_v8 }
 0x3e7   :  { %996 = vrot.lane.b32.xlu0 %v2393_v27, %s2073_s16  ;;  %994 = vrot.lane.b32.xlu1 %v2389_v25, %s2073_s16  ;;  %1955 = vpow2.f32 %v1783_v32 }
 0x3e8   :  { %1957 = vrcp.f32 %v789_v55  ;;  %v1948_v0 = vpop.eup %1947 }
 0x3e9   :  { %1959 = vpow2.f32 %v1792_v56  ;;  %v790_v12 = vadd.f32 1.0, %v1948_v0 }
 0x3ea   :  { %1961 = vpow2.f32 %v1790_v16 }
 0x3eb   :  { %1963 = vrcp.f32 %v953_v63 }
 0x3ec   :  { %v1950_v7 = vpop.eup %1949  ;;  %1965 = vrcp.f32 %v955_v58 }
 0x3ed   :  { %v791_v23 = vadd.f32 1.0, %v1950_v7  ;;  %1967 = vrcp.f32 %v790_v12 }
 0x3ef   :  { %1969 = vrcp.f32 %v791_v23 }
 0x3f0   :  { %v1952_v2 = vpop.eup %1951 }
 0x3f1   :  { %v792_v14 = vadd.f32 1.0, %v1952_v2  ;;  %v1954_v19 = vpop.eup %1953 }
 0x3f2   :  { %v957_v34 = vadd.f32 1.0, %v1954_v19 }
 0x3f3   :  { %1971 = vrcp.f32 %v792_v14 }
 0x3f4   :  { %v1956_v26 = vpop.eup %1955  ;;  %1973 = vrcp.f32 %v957_v34 }
 0x3f5   :  { %v2413_v30 = vpop.eup %1957  ;;  %v793_v36 = vadd.f32 1.0, %v1956_v26 }
 0x3f6   :  { %v1960_v35 = vpop.eup %1959 }
 0x3f7   :  { %v1962_v38 = vpop.eup %1961  ;;  %v961_v43 = vadd.f32 1.0, %v1960_v35  ;;  %1975 = vrcp.f32 %v793_v36 }
 0x3f8   :  { %v1964_v39 = vpop.eup %1963  ;;  %v959_v52 = vadd.f32 1.0, %v1962_v38 }
 0x3f9   :  { %v1966_v41 = vpop.eup %1965  ;;  %1977 = vrcp.f32 %v961_v43 }
 0x3fa   :  { %v2419_v47 = vpop.eup %1967  ;;  %1979 = vrcp.f32 %v959_v52 }
 0x3fc   :  { %v2421_v59 = vpop.eup %1969 }
 0x400   :  { %v2427_v49 = vpop.eup %1971 }
 0x401   :  { %v1974_v51 = vpop.eup %1973 }
 0x404   :  { %v2431_v8 = vpop.eup %1975 }
 0x406   :  { %v1978_v58 = vpop.eup %1977 }
 0x407   :  { %v1980_v7 = vpop.eup %1979 }
 0x444   :  { %v805_v20 = vpop.permute.xlu1 %804 }
 0x445   :  { %v819_v37 = vmul.f32 %v2413_v30, %v805_v20 }
 0x447   :  { %829 = vrot.lane.b32.xlu1 %v819_v37, %s2073_s16 }
 0x448   :  { %v989_v44 = vpop.permute.xlu1 %988  ;;  %v991_v31 = vpop.permute.xlu0 %990 }
 0x449   :  { %v1003_v45 = vmul.f32 %v1964_v39, %v989_v44  ;;  %v1004_v46 = vmul.f32 %v1966_v41, %v991_v31 }
 0x44b   :  { %1013 = vrot.lane.b32.xlu1 %v1003_v45, %s2073_s16  ;;  %1015 = vrot.lane.b32.xlu0 %v1004_v46, %s2073_s16 }
 0x44c   :  { %v807_v17 = vpop.permute.xlu0 %806 }
 0x44d   :  { %v820_v61 = vmul.f32 %v2419_v47, %v807_v17  ;;  %v809_v48 = vpop.permute.xlu1 %808 }
 0x44e   :  { %v821_v24 = vmul.f32 %v2421_v59, %v809_v48 }
 0x44f   :  { %831 = vrot.lane.b32.xlu0 %v820_v61, %s2073_s16 }
 0x450   :  { %833 = vrot.lane.b32.xlu1 %v821_v24, %s2073_s16 }
 0x451   :  { %v811_v33 = vpop.permute.xlu0 %810 }
 0x452   :  { %v822_v32 = vmul.f32 %v2427_v49, %v811_v33 }
 0x454   :  { %835 = vrot.lane.b32.xlu0 %v822_v32, %s2073_s16 }
 0x455   :  { %v993_v55 = vpop.permute.xlu0 %992  ;;  %v813_v56 = vpop.permute.xlu1 %812 }
 0x456   :  { %v1005_v16 = vmul.f32 %v1974_v51, %v993_v55  ;;  %v823_v63 = vmul.f32 %v2431_v8, %v813_v56 }
 0x458   :  { %1017 = vrot.lane.b32.xlu0 %v1005_v16, %s2073_s16  ;;  %837 = vrot.lane.b32.xlu1 %v823_v63, %s2073_s16  ;;  %v916_v16 = vadd.f32 %v2377_v5, %v2208_v62 }
 0x459   :  { %v997_v0 = vpop.permute.xlu0 %996  ;;  %v995_v12 = vpop.permute.xlu1 %994 }
 0x45a   :  { %v1007_v23 = vmul.f32 %v1978_v58, %v997_v0  ;;  %v1006_v2 = vmul.f32 %v1980_v7, %v995_v12  ;;  %v1787_v58 = vmul.f32 -1.442695, %v916_v16  ;;  %v918_v0 = vadd.f32 %v2383_v10, %v2212_v1 }
 0x45b   :  { %v856_v16 = vsub.f32 1.0, %v2421_v59 }
 0x45c   :  { %1021 = vrot.lane.b32.xlu0 %v1007_v23, %s2073_s16  ;;  %1019 = vrot.lane.b32.xlu1 %v1006_v2, %s2073_s16  ;;  %v1789_v12 = vmul.f32 -1.442695, %v918_v0  ;;  %v920_v23 = vadd.f32 %v2389_v25, %v2216_v3 }
 0x45e   :  { %v1791_v5 = vmul.f32 -1.442695, %v920_v23 }
 0x460   :  { %1366 = vrot.lane.b32.xlu0 %v2320_v21, %s2076_s17  ;;  %1368 = vrot.lane.b32.xlu1 %v2318_v13, %s2076_s17 }
 0x464   :  { %1370 = vrot.lane.b32.xlu0 %v2325_v40, %s2076_s17  ;;  %1098 = vrot.lane.b32.xlu1 %v2339_v53, %s2075_s1 }
 0x468   :  { %1372 = vrot.lane.b32.xlu0 %v2327_v42, %s2076_s17  ;;  %1102 = vrot.lane.b32.xlu1 %v2350_v28, %s2075_s1 }
 0x46c   :  { %1100 = vrot.lane.b32.xlu0 %v2341_v54, %s2075_s1  ;;  %1104 = vrot.lane.b32.xlu1 %v2348_v18, %s2075_s1 }
 0x470   :  { %1374 = vrot.lane.b32.xlu0 %v2334_v50, %s2076_s17  ;;  %1106 = vrot.lane.b32.xlu1 %v2357_v11, %s2075_s1 }
 0x4b9   :  { %v830_v14 = vpop.permute.xlu1 %829 }
 0x4ba   :  { %v844_v19 = vadd.f32 %v830_v14, %v2218_v4 }
 0x4bc   :  { %1981 = vtanh.f32 %v844_v19 }
 0x4bd   :  { %v1014_v26 = vpop.permute.xlu1 %1013  ;;  %v1016_v34 = vpop.permute.xlu0 %1015 }
 0x4be   :  { %v1028_v20 = vadd.f32 %v1014_v26, %v2204_v60  ;;  %v1029_v35 = vadd.f32 %v1016_v34, %v2208_v62  ;;  %v922_v62 = vadd.f32 %v2393_v27, %v2222_v6 }
 0x4c0   :  { %1983 = vtanh.f32 %v1028_v20  ;;  %v1793_v26 = vmul.f32 -1.442695, %v922_v62 }
 0x4c1   :  { %1985 = vtanh.f32 %v1029_v35  ;;  %v832_v36 = vpop.permute.xlu0 %831 }
 0x4c2   :  { %v845_v37 = vadd.f32 %v832_v36, %v2226_v9  ;;  %v834_v38 = vpop.permute.xlu1 %833 }
 0x4c3   :  { %v846_v39 = vadd.f32 %v834_v38, %v2234_v15  ;;  %v1075_v38 = vrot.slane %v2318_v13, 3 }
 0x4c4   :  { %1987 = vtanh.f32 %v845_v37 }
 0x4c5   :  { %1989 = vtanh.f32 %v846_v39  ;;  %v854_v39 = vsub.f32 1.0, %v2413_v30 }
 0x4c6   :  { %v836_v41 = vpop.permute.xlu0 %835 }
 0x4c7   :  { %v847_v45 = vadd.f32 %v836_v41, %v2244_v22  ;;  %v889_v41 = vrot.slane %v2339_v53, 5  ;;  %v890_v53 = vrot.slane %v2341_v54, 5  ;;  %v855_v54 = vsub.f32 1.0, %v2419_v47 }
 0x4c9   :  { %v1982_v43 = vpop.eup %1981 }
 0x4ca   :  { %864 = vrot.lane.b32.xlu1 %v1982_v43, %s2075_s1  ;;  %v1018_v4 = vpop.permute.xlu0 %1017  ;;  %v838_v44 = vpop.permute.xlu1 %837 }
 0x4cb   :  { %v1030_v31 = vadd.f32 %v1018_v4, %v2212_v1  ;;  %v848_v33 = vadd.f32 %v838_v44, %v2250_v29  ;;  %v914_v29 = vadd.f32 %v2374_v57, %v2204_v60  ;;  %v1077_v4 = vrot.slane %v2325_v40, 3 }
 0x4cd   :  { %v1984_v52 = vpop.eup %1983  ;;  %1991 = vtanh.f32 %v1030_v31  ;;  %v1785_v63 = vmul.f32 -1.442695, %v914_v29 }
 0x4ce   :  { %v1986_v46 = vpop.eup %1985  ;;  %1048 = vrot.lane.b32.xlu1 %v1984_v52, %s2075_s1  ;;  %v1022_v9 = vpop.permute.xlu0 %1021  ;;  %1993 = vtanh.f32 %v847_v45  ;;  %v1074_v52 = vrot.slane %v2320_v21, 3 }
 0x4cf   :  { %v1020_v17 = vpop.permute.xlu1 %1019  ;;  %1050 = vrot.lane.b32.xlu0 %v1986_v46, %s2075_s1  ;;  %v1032_v48 = vadd.f32 %v1022_v9, %v2222_v6  ;;  %v903_v9 = vmul.f32 %v2413_v30, %v889_v41 }
 0x4d0   :  { %v1031_v15 = vadd.f32 %v1020_v17, %v2216_v3 }
 0x4d1   :  { %v1988_v61 = vpop.eup %1987 }
 0x4d2   :  { %v1990_v24 = vpop.eup %1989  ;;  %1995 = vtanh.f32 %v1031_v15  ;;  %v2488_v2 = vpop.permute.xlu0 %1366 }
 0x4d3   :  { %866 = vrot.lane.b32.xlu0 %v1988_v61, %s2075_s1  ;;  %868 = vrot.lane.b32.xlu1 %v1990_v24, %s2075_s1  ;;  %1997 = vtanh.f32 %v1032_v48  ;;  %v2484_v7 = vpop.permute.xlu1 %1368  ;;  %v1076_v61 = vsel %vm1073_vm1, %v1074_v52, %v1075_v38  ;;  %v896_v52 = vrot.slane %v2357_v11, 5 }
 0x4d4   :  { %1999 = vtanh.f32 %v848_v33  ;;  %v1078_v33 = vsel %vm1073_vm1, %v1075_v38, %v1077_v4 }
 0x4d5   :  { %2001 = vpow2.f32 %v1785_v63  ;;  %v891_v63 = vsel %vm754_vm0, %v889_v41, %v890_v53  ;;  %v857_v41 = vsub.f32 1.0, %v2427_v49 }
 0x4d6   :  { %2003 = vpow2.f32 %v1787_v58  ;;  %v2494_v1 = vpop.permute.xlu0 %1370 }
 0x4d7   :  { %v2490_v14 = vpop.permute.xlu1 %1098  ;;  %2005 = vpow2.f32 %v1789_v12  ;;  %v904_v12 = vmul.f32 %v2419_v47, %v891_v63 }
 0x4d8   :  { %2007 = vpow2.f32 %v1791_v5 }
 0x4da   :  { %v1992_v22 = vpop.eup %1991  ;;  %v2498_v3 = vpop.permute.xlu0 %1372 }
 0x4db   :  { %1052 = vrot.lane.b32.xlu0 %v1992_v22, %s2075_s1  ;;  %v1994_v32 = vpop.eup %1993  ;;  %v2496_v34 = vpop.permute.xlu1 %1102  ;;  %v892_v22 = vrot.slane %v2350_v28, 5 }
 0x4dd   :  { %v893_v28 = vsel %vm754_vm0, %v890_v53, %v892_v22  ;;  %v858_v53 = vsub.f32 1.0, %v2431_v8 }
 0x4de   :  { %v2502_v6 = vpop.permute.xlu0 %1100 }
 0x4df   :  { %v1996_v51 = vpop.eup %1995  ;;  %870 = vrot.lane.b32.xlu0 %v1994_v32, %s2075_s1  ;;  %v2500_v25 = vpop.permute.xlu1 %1104 }
 0x4e0   :  { %1054 = vrot.lane.b32.xlu1 %v1996_v51, %s2075_s1  ;;  %v1998_v55 = vpop.eup %1997 }
 0x4e1   :  { %v2000_v56 = vpop.eup %1999 }
 0x4e2   :  { %v2002_v60 = vpop.eup %2001  ;;  %v2511_v46 = vpop.permute.xlu0 %1374 }
 0x4e3   :  { %1056 = vrot.lane.b32.xlu0 %v1998_v55, %s2075_s1  ;;  %v2004_v57 = vpop.eup %2003  ;;  %v954_v19 = vadd.f32 1.0, %v2002_v60  ;;  %v2504_v35 = vpop.permute.xlu1 %1106  ;;  %v905_v60 = vmul.f32 %v2421_v59, %v893_v28  ;;  %v1081_v59 = vrot.slane %v2334_v50, 3 }
 0x4e4   :  { %872 = vrot.lane.b32.xlu1 %v2000_v56, %s2075_s1  ;;  %v956_v10 = vadd.f32 1.0, %v2004_v57  ;;  %v2006_v20 = vpop.eup %2005 }
 0x4e5   :  { %2009 = vrcp.f32 %v954_v19  ;;  %v958_v27 = vadd.f32 1.0, %v2006_v20  ;;  %v2008_v36 = vpop.eup %2007  ;;  %v894_v20 = vrot.slane %v2348_v18, 5 }
 0x4e6   :  { %2011 = vpow2.f32 %v1793_v26  ;;  %v960_v45 = vadd.f32 1.0, %v2008_v36  ;;  %v1079_v26 = vrot.slane %v2327_v42, 3 }
 0x4e7   :  { %2013 = vrcp.f32 %v956_v10 }
 0x4e8   :  { %2015 = vrcp.f32 %v958_v27  ;;  %v1080_v47 = vsel %vm1073_vm1, %v1077_v4, %v1079_v26  ;;  %v1082_v18 = vsel %vm1073_vm1, %v1079_v26, %v1081_v59 }
 0x4e9   :  { %2017 = vrcp.f32 %v960_v45 }
 0x4f2   :  { %v2010_v37 = vpop.eup %2009 }
 0x4f3   :  { %v2012_v43 = vpop.eup %2011  ;;  %v1038_v15 = vsub.f32 1.0, %v2010_v37  ;;  %v1088_v21 = vmul.f32 %v2010_v37, %v1076_v61 }
 0x4f4   :  { %v2014_v31 = vpop.eup %2013  ;;  %v962_v48 = vadd.f32 1.0, %v2012_v43 }
 0x4f5   :  { %v1039_v24 = vsub.f32 1.0, %v2014_v31  ;;  %v1089_v30 = vmul.f32 %v2014_v31, %v1078_v33  ;;  %v2016_v19 = vpop.eup %2015 }
 0x4f6   :  { %2019 = vrcp.f32 %v962_v48  ;;  %v1040_v10 = vsub.f32 1.0, %v2016_v19  ;;  %v2018_v36 = vpop.eup %2017  ;;  %v1090_v37 = vmul.f32 %v2016_v19, %v1080_v47  ;;  %v2585_v19 = vld [vmem:[%s3008_s3 + $0xa0] sm:$0xff] }
 0x4f7   :  { %v1041_v42 = vsub.f32 1.0, %v2018_v36  ;;  %v1091_v50 = vmul.f32 %v2018_v36, %v1082_v18  ;;  %v2597_v36 = vld [vmem:[%s3008_s3 + $0xc8] sm:$0xff] }
 0x503   :  { %v2020_v43 = vpop.eup %2019 }
 0x504   :  { %v1092_v11 = vmul.f32 %v2020_v43, %v1081_v59  ;;  %v1593_v59 = vrot.slane %v2597_v36, 5 }
 0x53c   :  { %v865_v44 = vpop.permute.xlu1 %864 }
 0x53d   :  { %v879_v17 = vmul.f32 %v865_v44, %v854_v39  ;;  %v895_v44 = vsel %vm754_vm0, %v892_v22, %v894_v20 }
 0x53e   :  { %v906_v4 = vmul.f32 %v2427_v49, %v895_v44 }
 0x53f   :  { %v908_v13 = vadd.f32 %v903_v9, %v879_v17 }
 0x540   :  { %v1049_v40 = vpop.permute.xlu1 %1048 }
 0x541   :  { %v1063_v32 = vmul.f32 %v1049_v40, %v1038_v15  ;;  %v1051_v51 = vpop.permute.xlu0 %1050  ;;  %1351 = vrot.lane.b32.xlu1 %v908_v13, %s2075_s1  ;;  %v1042_v15 = vsub.f32 1.0, %v2020_v43  ;;  %v897_v40 = vsel %vm754_vm0, %v894_v20, %v896_v52 }
 0x542   :  { %v1064_v55 = vmul.f32 %v1051_v51, %v1039_v24  ;;  %v907_v49 = vmul.f32 %v2431_v8, %v897_v40  ;;  %v2549_v51 = vld [vmem:[%s3008_s3] sm:$0xff]  ;;  %v2559_v8 = vld [vmem:[%s3008_s3 + $0x28] sm:$0xff] }
 0x543   :  { %v1093_v56 = vadd.f32 %v1088_v21, %v1063_v32  ;;  %v1437_v63 = vrot.slane %v2559_v8, 5 }
 0x544   :  { %v1094_v29 = vadd.f32 %v1089_v30, %v1064_v55  ;;  %v2554_v30 = vld [vmem:[%s3008_s3 + $0x50] sm:$0xff] }
 0x545   :  { %v867_v58 = vpop.permute.xlu0 %866  ;;  %1118 = vrot.lane.b32.xlu1 %v1093_v56, %s2076_s17  ;;  %v869_v0 = vpop.permute.xlu1 %868  ;;  %v1396_v56 = vrot.slane %v2549_v51, 5 }
 0x546   :  { %v880_v23 = vmul.f32 %v867_v58, %v855_v54  ;;  %v881_v62 = vmul.f32 %v869_v0, %v856_v16  ;;  %1120 = vrot.lane.b32.xlu0 %v1094_v29, %s2076_s17  ;;  %v1476_v29 = vrot.slane %v2554_v30, 5  ;;  %v2569_v58 = vld [vmem:[%s3008_s3 + $0x78] sm:$0xff] }
 0x548   :  { %v909_v57 = vadd.f32 %v904_v12, %v880_v23  ;;  %v910_v5 = vadd.f32 %v905_v60, %v881_v62 }
 0x54a   :  { %1353 = vrot.lane.b32.xlu0 %v909_v57, %s2075_s1  ;;  %1355 = vrot.lane.b32.xlu1 %v910_v5, %s2075_s1 }
 0x54d   :  { %v1053_v27 = vpop.permute.xlu0 %1052 }
 0x54e   :  { %v1065_v38 = vmul.f32 %v1053_v27, %v1040_v10 }
 0x550   :  { %v1095_v39 = vadd.f32 %v1090_v37, %v1065_v38 }
 0x551   :  { %v871_v31 = vpop.permute.xlu0 %870 }
 0x552   :  { %v1055_v45 = vpop.permute.xlu1 %1054  ;;  %v882_v9 = vmul.f32 %v871_v31, %v857_v41  ;;  %1122 = vrot.lane.b32.xlu0 %v1095_v39, %s2076_s17 }
 0x553   :  { %v1066_v17 = vmul.f32 %v1055_v45, %v1041_v42 }
 0x554   :  { %v911_v13 = vadd.f32 %v906_v4, %v882_v9  ;;  %v2615_v4 = vld [vmem:[%s3008_s3 + $0x8] sm:$0xff] }
 0x555   :  { %v1096_v61 = vadd.f32 %v1091_v50, %v1066_v17  ;;  %v1057_v48 = vpop.permute.xlu0 %1056 }
 0x556   :  { %v873_v24 = vpop.permute.xlu1 %872  ;;  %v1067_v33 = vmul.f32 %v1057_v48, %v1042_v15  ;;  %1357 = vrot.lane.b32.xlu1 %v911_v13, %s2075_s1  ;;  %v2624_v15 = vld [vmem:[%s3008_s3 + $0xa8] sm:$0xff]  ;;  %v2632_v48 = vld [vmem:[%s3008_s3 + $0x30] sm:$0xff] }
 0x557   :  { %v883_v22 = vmul.f32 %v873_v24, %v858_v53  ;;  %1124 = vrot.lane.b32.xlu0 %v1096_v61, %s2076_s17  ;;  %v1397_v53 = vrot.slane %v2615_v4, 5 }
 0x558   :  { %v1097_v21 = vadd.f32 %v1092_v11, %v1067_v33 }
 0x559   :  { %v912_v32 = vadd.f32 %v907_v49, %v883_v22  ;;  %v1398_v22 = vsel %vm754_vm0, %v1396_v56, %v1397_v53 }
 0x55b   :  { %1359 = vrot.lane.b32.xlu1 %v912_v32, %s2075_s1  ;;  %1126 = vrot.lane.b32.xlu0 %v1097_v21, %s2076_s17  ;;  %v2647_v21 = vld [vmem:[%s3008_s3 + $0x80] sm:$0xff] }
 0x5b3   :  { %v1352_v55 = vpop.permute.xlu1 %1351 }
 0x5b4   :  { %v1381_v54 = vsel %vm612_vm13, %v1352_v55, %v2488_v2  ;;  %v1515_v2 = vrot.slane %v2569_v58, 5 }
 0x5b5   :  { %v1386_v16 = vmax.f32 %v1381_v54, 0.0 }
 0x5b7   :  { %v1119_v28 = vpop.permute.xlu1 %1118  ;;  %v1410_v0 = vmul.f32 %v1396_v56, %v1386_v16  ;;  %v1490_v12 = vmul.f32 %v1476_v29, %v1386_v16  ;;  %v1451_v5 = vmul.f32 %v1437_v63, %v1386_v16  ;;  %v1529_v47 = vmul.f32 %v1515_v2, %v1386_v16 }
 0x5b8   :  { %v1133_v23 = vsel %vm612_vm13, %v2490_v14, %v1119_v28  ;;  %v1554_v14 = vrot.slane %v2585_v19, 5  ;;  %v1121_v37 = vpop.permute.xlu0 %1120  ;;  %v1607_v42 = vmul.f32 %v1593_v59, %v1386_v16  ;;  %v1516_v28 = vrot.slane %v2647_v21, 5 }
 0x5b9   :  { %v1138_v60 = vmax.f32 %v1133_v23, 0.0  ;;  %v1416_v62 = vsel %vm1415_vm2, %v1410_v0, 0.0  ;;  %v1495_v57 = vsel %vm1415_vm2, %v1490_v12, 0.0  ;;  %v1456_v10 = vsel %vm1415_vm2, %v1451_v5, 0.0 }
 0x5ba   :  { %1417 = vadd.xlane.f32.xlu1 %v1416_v62  ;;  %1496 = vadd.xlane.f32.xlu0 %v1495_v57  ;;  %v1534_v38 = vsel %vm1415_vm2, %v1529_v47, 0.0  ;;  %v1568_v41 = vmul.f32 %v1554_v14, %v1386_v16  ;;  %v1134_v44 = vsel %vm612_vm13, %v2502_v6, %v1121_v37  ;;  %v1612_v50 = vsel %vm1415_vm2, %v1607_v42, 0.0 }
 0x5bb   :  { %v1148_v26 = vmul.f32 %v2549_v51, %v1138_v60  ;;  %v1175_v27 = vmul.f32 %v2559_v8, %v1138_v60  ;;  %v1201_v43 = vmul.f32 %v2554_v30, %v1138_v60  ;;  %v1227_v18 = vmul.f32 %v2569_v58, %v1138_v60  ;;  %v2655_v51 = vld [vmem:[%s3008_s3 + $0x58] sm:$0xff] }
 0x5bc   :  { %v1573_v31 = vsel %vm1415_vm2, %v1568_v41, 0.0  ;;  %v1354_v45 = vpop.permute.xlu0 %1353  ;;  %v1139_v9 = vmax.f32 %v1134_v44, 0.0  ;;  %v1253_v6 = vmul.f32 %v2585_v19, %v1138_v60  ;;  %v1279_v13 = vmul.f32 %v2597_v36, %v1138_v60  ;;  %v2707_v30 = vld [vmem:[%s3008_s3 + $0x38] sm:$0xff]  ;;  %v1356_v36 = vpop.permute.xlu1 %1355 }
 0x5bd   :  { %v1153_v20 = vsel %vm622_vm14, %v1148_v26, 0.0  ;;  %v1180_v39 = vsel %vm622_vm14, %v1175_v27, 0.0  ;;  %v1206_v52 = vsel %vm622_vm14, %v1201_v43, 0.0  ;;  %v1232_v17 = vsel %vm622_vm14, %v1227_v18, 0.0 }
 0x5be   :  { %1457 = vadd.xlane.f32.xlu1 %v1456_v10  ;;  %1154 = vadd.xlane.f32.xlu0 %v1153_v20  ;;  %v1382_v61 = vsel %vm612_vm13, %v1354_v45, %v2484_v7  ;;  %v1254_v40 = vmul.f32 %v2624_v15, %v1139_v9  ;;  %v1258_v11 = vsel %vm622_vm14, %v1253_v6, 0.0  ;;  %v1284_v33 = vsel %vm622_vm14, %v1279_v13, 0.0 }
 0x5bf   :  { %v1387_v24 = vmax.f32 %v1382_v61, 0.0  ;;  %v1149_v49 = vmul.f32 %v2615_v4, %v1139_v9  ;;  %v1438_v7 = vrot.slane %v2632_v48, 5  ;;  %v1176_v54 = vmul.f32 %v2632_v48, %v1139_v9 }
 0x5c0   :  { %v1261_v32 = vsel %vm622_vm14, %v1254_v40, 0.0  ;;  %v1202_v23 = vmul.f32 %v2655_v51, %v1139_v9  ;;  %v1555_v62 = vrot.slane %v2624_v15, 5  ;;  %v1517_v8 = vsel %vm754_vm0, %v1515_v2, %v1516_v28 }
 0x5c1   :  { %v1156_v55 = vsel %vm622_vm14, %v1149_v49, 0.0  ;;  %v1411_v16 = vmul.f32 %v1398_v22, %v1387_v24  ;;  %v1439_v56 = vsel %vm754_vm0, %v1437_v63, %v1438_v7  ;;  %v1183_v0 = vsel %vm622_vm14, %v1176_v54, 0.0  ;;  %v2675_v63 = vld [vmem:[%s3008_s3 + $0xd0] sm:$0xff]  ;;  %v2740_v49 = vld [vmem:[%s3008_s3 + $0xd8] sm:$0xff] }
 0x5c2   :  { %1535 = vadd.xlane.f32.xlu1 %v1534_v38  ;;  %1181 = vadd.xlane.f32.xlu0 %v1180_v39  ;;  %v1452_v60 = vmul.f32 %v1439_v56, %v1387_v24  ;;  %v1209_v57 = vsel %vm622_vm14, %v1202_v23, 0.0  ;;  %v1228_v26 = vmul.f32 %v2647_v21, %v1139_v9  ;;  %v1530_v10 = vmul.f32 %v1517_v8, %v1387_v24  ;;  %v2745_v22 = vld [vmem:[%s3008_s3 + $0xb0] sm:$0xff] }
 0x5c3   :  { %v1419_v12 = vsel %vm622_vm14, %v1411_v16, 0.0  ;;  %v1477_v20 = vrot.slane %v2655_v51, 5  ;;  %v1594_v58 = vrot.slane %v2675_v63, 5  ;;  %v1556_v2 = vsel %vm754_vm0, %v1554_v14, %v1555_v62 }
 0x5c4   :  { %v1459_v5 = vsel %vm622_vm14, %v1452_v60, 0.0  ;;  %v1123_v47 = vpop.permute.xlu0 %1122  ;;  %v1280_v27 = vmul.f32 %v2675_v63, %v1139_v9  ;;  %v1235_v37 = vsel %vm622_vm14, %v1228_v26, 0.0  ;;  %v1537_v38 = vsel %vm622_vm14, %v1530_v10, 0.0 }
 0x5c5   :  { %v1569_v39 = vmul.f32 %v1556_v2, %v1387_v24  ;;  %v1135_v41 = vsel %vm612_vm13, %v2496_v34, %v1123_v47  ;;  %v1478_v19 = vsel %vm754_vm0, %v1476_v29, %v1477_v20  ;;  %v1595_v14 = vsel %vm754_vm0, %v1593_v59, %v1594_v58  ;;  %v2712_v29 = vld [vmem:[%s3008_s3 + $0x10] sm:$0xff] }
 0x5c6   :  { %1574 = vadd.xlane.f32.xlu1 %v1573_v31  ;;  %1207 = vadd.xlane.f32.xlu0 %v1206_v52  ;;  %v1287_v43 = vsel %vm622_vm14, %v1280_v27, 0.0  ;;  %v1140_v42 = vmax.f32 %v1135_v41, 0.0  ;;  %v1491_v34 = vmul.f32 %v1478_v19, %v1387_v24  ;;  %v1608_v31 = vmul.f32 %v1595_v14, %v1387_v24  ;;  %v2801_v19 = vld [vmem:[%s3008_s3 + $0x68] sm:$0xff] }
 0x5c7   :  { %v1576_v44 = vsel %vm622_vm14, %v1569_v39, 0.0  ;;  %v1383_v9 = vsel %vm612_vm13, %v1356_v36, %v2494_v1  ;;  %v1440_v1 = vrot.slane %v2707_v30, 5  ;;  %v1399_v24 = vrot.slane %v2712_v29, 5 }
 0x5c8   :  { %v1498_v59 = vsel %vm622_vm14, %v1491_v34, 0.0  ;;  %v1615_v52 = vsel %vm622_vm14, %v1608_v31, 0.0  ;;  %v1177_v18 = vmul.f32 %v2707_v30, %v1140_v42  ;;  %v1150_v45 = vmul.f32 %v2712_v29, %v1140_v42  ;;  %v1358_v51 = vpop.permute.xlu1 %1357  ;;  %v2819_v31 = vld [vmem:[%s3008_s3 + $0x18] sm:$0xff]  ;;  %v1147_v29 = vld [vmem:[%s3008_s3 + $0x20] sm:$0x7] }
 0x5c9   :  { %v1281_v54 = vmul.f32 %v2740_v49, %v1140_v42  ;;  %v1255_v16 = vmul.f32 %v2745_v22, %v1140_v42  ;;  %v1125_v23 = vpop.permute.xlu0 %1124  ;;  %v1557_v60 = vrot.slane %v2745_v22, 5  ;;  %v1596_v47 = vrot.slane %v2740_v49, 5 }
 0x5ca   :  { %1613 = vadd.xlane.f32.xlu1 %v1612_v50  ;;  %1233 = vadd.xlane.f32.xlu0 %v1232_v17  ;;  %v2723_v50 = vld [vmem:[%s3008_s3 + $0x88] sm:$0xff]  ;;  %v2728_v17 = vld [vmem:[%s3008_s3 + $0x60] sm:$0xff]  ;;  %v1186_v6 = vsel %vm622_vm14, %v1177_v18, 0.0  ;;  %v1159_v13 = vsel %vm622_vm14, %v1150_v45, 0.0  ;;  %v1136_v4 = vsel %vm612_vm13, %v2500_v25, %v1125_v23  ;;  %v1481_v34 = vrot.slane %v2801_v19, 5 }
 0x5cb   :  { %v1229_v61 = vmul.f32 %v2723_v50, %v1140_v42  ;;  %v1203_v40 = vmul.f32 %v2728_v17, %v1140_v42  ;;  %v1479_v56 = vrot.slane %v2728_v17, 5  ;;  %v1264_v48 = vsel %vm622_vm14, %v1255_v16, 0.0 }
 0x5cc   :  { %v1558_v21 = vsel %vm754_vm0, %v1555_v62, %v1557_v60  ;;  %v1597_v41 = vsel %vm754_vm0, %v1594_v58, %v1596_v47 }
 0x5cd   :  { %v1482_v45 = vsel %vm754_vm0, %v1479_v56, %v1481_v34  ;;  %v1127_v17 = vpop.permute.xlu0 %1126  ;;  %v1360_v23 = vpop.permute.xlu1 %1359 }
 0x5ce   :  { %1259 = vadd.xlane.f32.xlu1 %v1258_v11  ;;  %1285 = vadd.xlane.f32.xlu0 %v1284_v33  ;;  %v1388_v11 = vmax.f32 %v1383_v9, 0.0  ;;  %v1518_v33 = vrot.slane %v2723_v50, 5  ;;  %v2832_v9 = vld [vmem:[%s3008_s3 + $0xe0] sm:$0xff] }
 0x5cf   :  { %v1598_v49 = vrot.slane %v2832_v9, 5 }
 0x5d0   :  { %v1519_v8 = vsel %vm754_vm0, %v1516_v28, %v1518_v33  ;;  %v2778_v28 = vmax.f32 %v1136_v4, 0.0  ;;  %v1570_v15 = vmul.f32 %v1558_v21, %v1388_v11  ;;  %v1385_v4 = vsel %vm612_vm13, %v1360_v23, %v2511_v46  ;;  %v1808_v46 = vld [vmem:[%s3008_s3 + $0x98] sm:$0x7] }
 0x5d1   :  { %v1531_v26 = vmul.f32 %v1519_v8, %v1388_v11 }
 0x5d2   :  { %1262 = vadd.xlane.f32.xlu0 %v1261_v32  ;;  %1157 = vadd.xlane.f32.xlu1 %v1156_v55  ;;  %v1238_v32 = vsel %vm622_vm14, %v1229_v61, 0.0  ;;  %v1212_v55 = vsel %vm622_vm14, %v1203_v40, 0.0  ;;  %v1579_v14 = vsel %vm622_vm14, %v1570_v15, 0.0  ;;  %v1204_v40 = vmul.f32 %v2801_v19, %v2778_v28 }
 0x5d3   :  { %v1540_v62 = vsel %vm622_vm14, %v1531_v26, 0.0 }
 0x5d4   :  { %v1215_v16 = vsel %vm622_vm14, %v1204_v40, 0.0  ;;  %v1282_v40 = vmul.f32 %v2832_v9, %v2778_v28 }
 0x5d6   :  { %1184 = vadd.xlane.f32.xlu1 %v1183_v0  ;;  %1420 = vadd.xlane.f32.xlu0 %v1419_v12  ;;  %v1441_v0 = vsel %vm754_vm0, %v1438_v7, %v1440_v1  ;;  %v1400_v12 = vsel %vm754_vm0, %v1397_v53, %v1399_v24  ;;  %v1480_v53 = vsel %vm754_vm0, %v1477_v20, %v1479_v56  ;;  %v2786_v20 = vld [vmem:[%s3008_s3 + $0x40] sm:$0xff] }
 0x5d7   :  { %v1453_v7 = vmul.f32 %v1441_v0, %v1388_v11  ;;  %v1492_v25 = vmul.f32 %v1480_v53, %v1388_v11  ;;  %v1442_v39 = vrot.slane %v2786_v20, 5  ;;  %v1599_v0 = vsel %vm754_vm0, %v1596_v47, %v1598_v49 }
 0x5d9   :  { %v1462_v10 = vsel %vm622_vm14, %v1453_v7, 0.0  ;;  %v1501_v27 = vsel %vm622_vm14, %v1492_v25, 0.0  ;;  %v1443_v58 = vsel %vm754_vm0, %v1440_v1, %v1442_v39  ;;  %v1401_v1 = vrot.slane %v2819_v31, 5 }
 0x5da   :  { %1210 = vadd.xlane.f32.xlu1 %v1209_v57  ;;  %1460 = vadd.xlane.f32.xlu0 %v1459_v5  ;;  %v1290_v57 = vsel %vm622_vm14, %v1281_v54, 0.0  ;;  %v1412_v5 = vmul.f32 %v1400_v12, %v1388_v11  ;;  %v1390_v25 = vmax.f32 %v1385_v4, 0.0 }
 0x5dc   :  { %v1422_v2 = vsel %vm622_vm14, %v1412_v5, 0.0 }
 0x5de   :  { %1236 = vadd.xlane.f32.xlu1 %v1235_v37  ;;  %1538 = vadd.xlane.f32.xlu0 %v1537_v38  ;;  %v1178_v37 = vmul.f32 %v2786_v20, %v2778_v28  ;;  %v1384_v38 = vsel %vm612_vm13, %v1358_v51, %v2498_v3 }
 0x5df   :  { %v1389_v3 = vmax.f32 %v1384_v38, 0.0 }
 0x5e0   :  { %v1189_v42 = vsel %vm622_vm14, %v1178_v37, 0.0 }
 0x5e1   :  { %v1493_v61 = vmul.f32 %v1482_v45, %v1389_v3 }
 0x5e2   :  { %1288 = vadd.xlane.f32.xlu1 %v1287_v43  ;;  %1577 = vadd.xlane.f32.xlu0 %v1576_v44  ;;  %v2807_v43 = vld [vmem:[%s3008_s3 + $0x90] sm:$0xff]  ;;  %v1609_v44 = vmul.f32 %v1597_v41, %v1388_v11  ;;  %v1522_v41 = vrot.slane %v1808_v46, 5 }
 0x5e3   :  { %v1230_v63 = vmul.f32 %v2807_v43, %v2778_v28  ;;  %v1520_v18 = vrot.slane %v2807_v43, 5  ;;  %v1504_v54 = vsel %vm622_vm14, %v1493_v61, 0.0 }
 0x5e4   :  { %v1618_v30 = vsel %vm622_vm14, %v1609_v44, 0.0 }
 0x5e5   :  { %v1241_v36 = vsel %vm622_vm14, %v1230_v63, 0.0  ;;  %v1521_v11 = vsel %vm754_vm0, %v1518_v33, %v1520_v18 }
 0x5e6   :  { %1499 = vadd.xlane.f32.xlu1 %v1498_v59  ;;  %1616 = vadd.xlane.f32.xlu0 %v1615_v52  ;;  %v1454_v59 = vmul.f32 %v1443_v58, %v1389_v3  ;;  %v1151_v52 = vmul.f32 %v2819_v31, %v2778_v28  ;;  %v1532_v56 = vmul.f32 %v1521_v11, %v1389_v3  ;;  %v1293_v11 = vsel %vm622_vm14, %v1282_v40, 0.0 }
 0x5e7   :  { %v1523_v58 = vsel %vm754_vm0, %v1520_v18, %v1522_v41 }
 0x5e8   :  { %v1543_v8 = vsel %vm622_vm14, %v1532_v56, 0.0 }
 0x5ea   :  { %1187 = vadd.xlane.f32.xlu1 %v1186_v6  ;;  %1160 = vadd.xlane.f32.xlu0 %v1159_v13  ;;  %v1465_v6 = vsel %vm622_vm14, %v1454_v59, 0.0  ;;  %v1162_v13 = vsel %vm622_vm14, %v1151_v52, 0.0 }
 0x5ee   :  { %1239 = vadd.xlane.f32.xlu1 %v1238_v32  ;;  %1213 = vadd.xlane.f32.xlu0 %v1212_v55  ;;  %v2848_v32 = vld [vmem:[%s3008_s3 + $0xb8] sm:$0xff]  ;;  %v1137_v55 = vsel %vm612_vm13, %v2504_v35, %v1127_v17  ;;  %v1402_v35 = vsel %vm754_vm0, %v1399_v24, %v1401_v1  ;;  %v1798_v24 = vld [vmem:[%s3008_s3 + $0x48] sm:$0x7]  ;;  %vm1695_vm13 = vcmask 41984  }
 0x5ef   :  { %v1256_v50 = vmul.f32 %v2848_v32, %v2778_v28  ;;  %v1559_v33 = vrot.slane %v2848_v32, 5  ;;  %v2863_v12 = vmax.f32 %v1137_v55, 0.0  ;;  %v1413_v7 = vmul.f32 %v1402_v35, %v1389_v3 }
 0x5f1   :  { %v1560_v5 = vsel %vm754_vm0, %v1557_v60, %v1559_v33  ;;  %v1425_v26 = vsel %vm622_vm14, %v1413_v7, 0.0  ;;  %v1152_v22 = vmul.f32 %v1147_v29, %v2863_v12  ;;  %v1803_v60 = vld [vmem:[%s3008_s3 + $0x70] sm:$0x7] }
 0x5f2   :  { %1291 = vadd.xlane.f32.xlu1 %v1290_v57  ;;  %1265 = vadd.xlane.f32.xlu0 %v1264_v48  ;;  %v1267_v57 = vsel %vm622_vm14, %v1256_v50, 0.0  ;;  %v1610_v48 = vmul.f32 %v1599_v0, %v1389_v3  ;;  %v1571_v21 = vmul.f32 %v1560_v5, %v1389_v3  ;;  %v1483_v47 = vrot.slane %v1803_v60, 5  ;;  %v1813_v3 = vld [vmem:[%s3008_s3 + $0xc0] sm:$0x7] }
 0x5f3   :  { %v1166_v15 = vsel %vm1165_vm3, %v1152_v22, 0.0  ;;  %v1257_v55 = vmul.f32 %v1813_v3, %v2863_v12 }
 0x5f4   :  { %v1621_v53 = vsel %vm622_vm14, %v1610_v48, 0.0  ;;  %v1582_v51 = vsel %vm622_vm14, %v1571_v21, 0.0 }
 0x5f6   :  { %1463 = vadd.xlane.f32.xlu1 %v1462_v10  ;;  %1423 = vadd.xlane.f32.xlu0 %v1422_v2  ;;  %v1403_v10 = vrot.slane %v1147_v29, 5  ;;  %v1444_v2 = vrot.slane %v1798_v24, 5 }
 0x5f8   :  { %v1445_v37 = vsel %vm754_vm0, %v1442_v39, %v1444_v2  ;;  %v1404_v38 = vsel %vm754_vm0, %v1401_v1, %v1403_v10  ;;  %v1231_v1 = vmul.f32 %v1808_v46, %v2863_v12 }
 0x5f9   :  { %v1455_v39 = vmul.f32 %v1445_v37, %v1390_v25  ;;  %v1414_v63 = vmul.f32 %v1404_v38, %v1390_v25 }
 0x5fa   :  { %1541 = vadd.xlane.f32.xlu1 %v1540_v62  ;;  %1502 = vadd.xlane.f32.xlu0 %v1501_v27  ;;  %v1179_v62 = vmul.f32 %v1798_v24, %v2863_v12  ;;  %v1205_v27 = vmul.f32 %v1803_v60, %v2863_v12 }
 0x5fb   :  { %v1429_v19 = vsel %vm1428_vm4, %v1414_v63, 0.0 }
 0x5fc   :  { %v1192_v44 = vsel %vm1165_vm3, %v1179_v62, 0.0  ;;  %v1218_v20 = vsel %vm1165_vm3, %v1205_v27, 0.0 }
 0x5fe   :  { %1580 = vadd.xlane.f32.xlu1 %v1579_v14  ;;  %1190 = vadd.xlane.f32.xlu0 %v1189_v42  ;;  %v1818_v14 = vld [vmem:[%s3008_s3 + $0xe8] sm:$0x7]  ;;  %v1484_v42 = vsel %vm754_vm0, %v1481_v34, %v1483_v47  ;;  %v1533_v34 = vmul.f32 %v1523_v58, %v1390_v25 }
 0x5ff   :  { %v1600_v31 = vrot.slane %v1818_v14, 5  ;;  %v1494_v59 = vmul.f32 %v1484_v42, %v1390_v25  ;;  %v1283_v32 = vmul.f32 %v1818_v14, %v2863_v12 }
 0x600   :  { %v1546_v43 = vsel %vm1428_vm4, %v1533_v34, 0.0 }
 0x601   :  { %v1601_v52 = vsel %vm754_vm0, %v1598_v49, %v1600_v31  ;;  %v1507_v18 = vsel %vm1428_vm4, %v1494_v59, 0.0  ;;  %v1244_v49 = vsel %vm1165_vm3, %v1231_v1, 0.0 }
 0x602   :  { %1619 = vadd.xlane.f32.xlu1 %v1618_v30  ;;  %1242 = vadd.xlane.f32.xlu0 %v1241_v36  ;;  %v1561_v30 = vrot.slane %v1813_v3, 5  ;;  %v1468_v36 = vsel %vm1428_vm4, %v1455_v39, 0.0  ;;  %v1611_v17 = vmul.f32 %v1601_v52, %v1390_v25 }
 0x604   :  { %v1562_v45 = vsel %vm754_vm0, %v1559_v33, %v1561_v30 }
 0x606   :  { %1466 = vadd.xlane.f32.xlu0 %v1465_v6  ;;  %1163 = vadd.xlane.f32.xlu1 %v1162_v13  ;;  %v1572_v6 = vmul.f32 %v1562_v45, %v1390_v25  ;;  %v1624_v13 = vsel %vm1428_vm4, %v1611_v17, 0.0 }
 0x608   :  { %v1585_v61 = vsel %vm1428_vm4, %v1572_v6, 0.0 }
 0x60a   :  { %1505 = vadd.xlane.f32.xlu0 %v1504_v54  ;;  %1216 = vadd.xlane.f32.xlu1 %v1215_v16  ;;  %v1296_v54 = vsel %vm1165_vm3, %v1283_v32, 0.0  ;;  %v1270_v16 = vsel %vm1165_vm3, %v1257_v55, 0.0 }
 0x60e   :  { %1544 = vadd.xlane.f32.xlu0 %v1543_v8  ;;  %1268 = vadd.xlane.f32.xlu1 %v1267_v57 }
 0x612   :  { %1622 = vadd.xlane.f32.xlu0 %v1621_v53  ;;  %1426 = vadd.xlane.f32.xlu1 %v1425_v26 }
 0x616   :  { %1583 = vadd.xlane.f32.xlu1 %v1582_v51  ;;  %1167 = vadd.xlane.f32.xlu0 %v1166_v15 }
 0x61a   :  { %1193 = vadd.xlane.f32.xlu1 %v1192_v44  ;;  %1219 = vadd.xlane.f32.xlu0 %v1218_v20 }
 0x61e   :  { %1469 = vadd.xlane.f32.xlu1 %v1468_v36  ;;  %1430 = vadd.xlane.f32.xlu0 %v1429_v19 }
 0x622   :  { %1547 = vadd.xlane.f32.xlu1 %v1546_v43  ;;  %1508 = vadd.xlane.f32.xlu0 %v1507_v18 }
 0x626   :  { %1625 = vadd.xlane.f32.xlu1 %v1624_v13  ;;  %1586 = vadd.xlane.f32.xlu0 %v1585_v61 }
 0x62a   :  { %1294 = vadd.xlane.f32.xlu1 %v1293_v11  ;;  %1245 = vadd.xlane.f32.xlu0 %v1244_v49 }
 0x62e   :  { %1297 = vadd.xlane.f32.xlu1 %v1296_v54  ;;  %1271 = vadd.xlane.f32.xlu0 %v1270_v16 }
 0x643   :  { %v1418_v28 = vpop.xlane.xlu1 %1417  ;;  %v1497_v9 = vpop.xlane.xlu0 %1496 }
 0x647   :  { %v1458_v56 = vpop.xlane.xlu1 %1457  ;;  %v1155_v50 = vpop.xlane.xlu0 %1154 }
 0x648   :  { %v1627_v33 = vsel %vm1299_vm5, %v1418_v28, %v1458_v56 }
 0x649   :  { %v1632_v0 = vsel %vm1305_vm6, %v1627_v33, %v1497_v9 }
 0x64b   :  { %v1536_v35 = vpop.xlane.xlu1 %1535  ;;  %v1182_v12 = vpop.xlane.xlu0 %1181 }
 0x64c   :  { %v1637_v23 = vsel %vm1311_vm7, %v1632_v0, %v1536_v35  ;;  %v1300_v8 = vsel %vm1299_vm5, %v1155_v50, %v1182_v12 }
 0x64f   :  { %v1575_v57 = vpop.xlane.xlu1 %1574  ;;  %v1208_v48 = vpop.xlane.xlu0 %1207 }
 0x650   :  { %v1642_v7 = vsel %vm1317_vm8, %v1637_v23, %v1575_v57  ;;  %v1306_v5 = vsel %vm1305_vm6, %v1300_v8, %v1208_v48 }
 0x653   :  { %v1614_v29 = vpop.xlane.xlu1 %1613  ;;  %v1234_v24 = vpop.xlane.xlu0 %1233 }
 0x654   :  { %v1647_v4 = vsel %vm1323_vm9, %v1642_v7, %v1614_v29  ;;  %v1312_v53 = vsel %vm1311_vm7, %v1306_v5, %v1234_v24 }
 0x655   :  { %v1657_v45 = vrot.slane %v1647_v4, 3 }
 0x657   :  { %v1260_v26 = vpop.xlane.xlu1 %1259  ;;  %v1286_v21 = vpop.xlane.xlu0 %1285 }
 0x658   :  { %v1318_v22 = vsel %vm1317_vm8, %v1312_v53, %v1260_v26 }
 0x659   :  { %v1324_v60 = vsel %vm1323_vm9, %v1318_v22, %v1286_v21 }
 0x65a   :  { %v1330_v20 = vsel %vm1329_vm10, %v1324_v60, 0.0 }
 0x65b   :  { %v1158_v10 = vpop.xlane.xlu1 %1157  ;;  %v1263_v2 = vpop.xlane.xlu0 %1262 }
 0x65f   :  { %v1185_v46 = vpop.xlane.xlu1 %1184  ;;  %v1421_v25 = vpop.xlane.xlu0 %1420 }
 0x660   :  { %v1301_v47 = vsel %vm1299_vm5, %v1158_v10, %v1185_v46 }
 0x663   :  { %v1211_v51 = vpop.xlane.xlu1 %1210  ;;  %v1461_v15 = vpop.xlane.xlu0 %1460 }
 0x664   :  { %v1307_v62 = vsel %vm1305_vm6, %v1301_v47, %v1211_v51  ;;  %v1628_v27 = vsel %vm1299_vm5, %v1421_v25, %v1461_v15 }
 0x667   :  { %v1237_v37 = vpop.xlane.xlu1 %1236  ;;  %v1539_v38 = vpop.xlane.xlu0 %1538 }
 0x668   :  { %v1313_v41 = vsel %vm1311_vm7, %v1307_v62, %v1237_v37 }
 0x669   :  { %v1319_v14 = vsel %vm1317_vm8, %v1313_v41, %v1263_v2 }
 0x66b   :  { %v1289_v3 = vpop.xlane.xlu1 %1288  ;;  %v1578_v42 = vpop.xlane.xlu0 %1577 }
 0x66c   :  { %v1325_v44 = vsel %vm1323_vm9, %v1319_v14, %v1289_v3 }
 0x66d   :  { %v1331_v39 = vsel %vm1329_vm10, %v1325_v44, 0.0 }
 0x66e   :  { %v2946_v63 = vadd.f32 %v1331_v39, %v1330_v20 }
 0x66f   :  { %v1500_v58 = vpop.xlane.xlu1 %1499  ;;  %v1617_v31 = vpop.xlane.xlu0 %1616 }
 0x670   :  { %v1633_v30 = vsel %vm1305_vm6, %v1628_v27, %v1500_v58 }
 0x671   :  { %v1638_v36 = vsel %vm1311_vm7, %v1633_v30, %v1539_v38 }
 0x672   :  { %v1643_v19 = vsel %vm1317_vm8, %v1638_v36, %v1578_v42 }
 0x673   :  { %v1648_v34 = vsel %vm1323_vm9, %v1643_v19, %v1617_v31  ;;  %v1188_v59 = vpop.xlane.xlu1 %1187  ;;  %v1161_v52 = vpop.xlane.xlu0 %1160 }
 0x674   :  { %v1658_v43 = vrot.slane %v1648_v34, 3  ;;  %v1302_v62 = vsel %vm1299_vm5, %v1161_v52, %v1188_v59 }
 0x676   :  { %v1659_v18 = vsel %vm1073_vm1, %v1657_v45, %v1658_v43 }
 0x677   :  { %v1240_v17 = vpop.xlane.xlu1 %1239  ;;  %v1214_v6 = vpop.xlane.xlu0 %1213  ;;  %v1671_v8 = vsel %vm1329_vm10, %v1659_v18, 0.0 }
 0x678   :  { %v1308_v27 = vsel %vm1305_vm6, %v1302_v62, %v1214_v6 }
 0x679   :  { %v1314_v42 = vsel %vm1311_vm7, %v1308_v27, %v1240_v17 }
 0x67b   :  { %v1292_v13 = vpop.xlane.xlu1 %1291  ;;  %v1266_v61 = vpop.xlane.xlu0 %1265 }
 0x67c   :  { %v1320_v44 = vsel %vm1317_vm8, %v1314_v42, %v1266_v61 }
 0x67d   :  { %v1326_v34 = vsel %vm1323_vm9, %v1320_v44, %v1292_v13 }
 0x67f   :  { %v1464_v40 = vpop.xlane.xlu1 %1463  ;;  %v1424_v1 = vpop.xlane.xlu0 %1423 }
 0x680   :  { %v1629_v32 = vsel %vm1299_vm5, %v1424_v1, %v1464_v40  ;;  %v1333_v40 = vsel %vm1329_vm10, %v1326_v34, 0.0 }
 0x683   :  { %v1542_v11 = vpop.xlane.xlu1 %1541  ;;  %v1503_v49 = vpop.xlane.xlu0 %1502 }
 0x684   :  { %v1634_v55 = vsel %vm1305_vm6, %v1629_v32, %v1503_v49 }
 0x685   :  { %v1639_v28 = vsel %vm1311_vm7, %v1634_v55, %v1542_v11 }
 0x687   :  { %v1581_v54 = vpop.xlane.xlu1 %1580  ;;  %v1191_v16 = vpop.xlane.xlu0 %1190 }
 0x688   :  { %v1644_v9 = vsel %vm1317_vm8, %v1639_v28, %v1581_v54 }
 0x68b   :  { %v1620_v56 = vpop.xlane.xlu1 %1619  ;;  %v1243_v50 = vpop.xlane.xlu0 %1242 }
 0x68c   :  { %v1649_v33 = vsel %vm1323_vm9, %v1644_v9, %v1620_v56 }
 0x68d   :  { %v1660_v0 = vrot.slane %v1649_v33, 3 }
 0x68f   :  { %v1661_v35 = vsel %vm1073_vm1, %v1658_v43, %v1660_v0  ;;  %v1164_v12 = vpop.xlane.xlu1 %1163  ;;  %v1467_v23 = vpop.xlane.xlu0 %1466 }
 0x690   :  { %v1672_v57 = vsel %vm1329_vm10, %v1661_v35, 0.0  ;;  %v1303_v20 = vsel %vm1299_vm5, %v1164_v12, %v1191_v16  ;;  %v1334_v16 = vadd.f32 %v1333_v40, %v2946_v63 }
 0x691   :  { %v1673_v48 = vadd.f32 %v1672_v57, %v1671_v8 }
 0x693   :  { %v1217_v7 = vpop.xlane.xlu1 %1216  ;;  %v1506_v5 = vpop.xlane.xlu0 %1505 }
 0x694   :  { %v1309_v58 = vsel %vm1305_vm6, %v1303_v20, %v1217_v7 }
 0x695   :  { %v1315_v45 = vsel %vm1311_vm7, %v1309_v58, %v1243_v50 }
 0x697   :  { %v1269_v29 = vpop.xlane.xlu1 %1268  ;;  %v1545_v24 = vpop.xlane.xlu0 %1544 }
 0x698   :  { %v1321_v18 = vsel %vm1317_vm8, %v1315_v45, %v1269_v29 }
 0x69b   :  { %v1427_v4 = vpop.xlane.xlu1 %1426  ;;  %v1623_v53 = vpop.xlane.xlu0 %1622 }
 0x69c   :  { %v1630_v26 = vsel %vm1299_vm5, %v1427_v4, %v1467_v23 }
 0x69d   :  { %v1635_v21 = vsel %vm1305_vm6, %v1630_v26, %v1506_v5 }
 0x69e   :  { %v1640_v10 = vsel %vm1311_vm7, %v1635_v21, %v1545_v24 }
 0x69f   :  { %v1584_v22 = vpop.xlane.xlu1 %1583  ;;  %v1168_v60 = vpop.xlane.xlu0 %1167 }
 0x6a0   :  { %v1645_v25 = vsel %vm1317_vm8, %v1640_v10, %v1584_v22 }
 0x6a1   :  { %v1650_v47 = vsel %vm1323_vm9, %v1645_v25, %v1623_v53 }
 0x6a2   :  { %v1662_v37 = vrot.slane %v1650_v47, 3 }
 0x6a3   :  { %v1194_v2 = vpop.xlane.xlu1 %1193  ;;  %v1220_v46 = vpop.xlane.xlu0 %1219 }
 0x6a4   :  { %v1663_v39 = vsel %vm1073_vm1, %v1660_v0, %v1662_v37  ;;  %v1304_v17 = vsel %vm1299_vm5, %v1168_v60, %v1194_v2  ;;  %v1819_v60 = vld [vmem:[%s3009_s4] ss:$0 sm:$0xff]  ;;  %s2045_s4 = scalar_lea.vmem %s1715_s24, 32 }
 0x6a5   :  { %v1674_v59 = vsel %vm1329_vm10, %v1663_v39, 0.0  ;;  %v1310_v32 = vsel %vm1305_vm6, %v1304_v17, %v1220_v46  ;;  %p2046_p5 = scmp.ne.s32.totalorder %s1715_s24, %s2045_s4  ;;  %p2051_p7 = scmp.lt.s32.totalorder %s2045_s4, %s2045_s4 }
 0x6a6   :  { %v1675_v1 = vadd.f32 %v1674_v59, %v1673_v48 }
 0x6a7   :  { %v1470_v51 = vpop.xlane.xlu1 %1469  ;;  %v1431_v15 = vpop.xlane.xlu0 %1430  ;;  %p2052_p8 = por %p2051_p7, %p2050_p6 }
 0x6a8   :  { %v1631_v38 = vsel %vm1299_vm5, %v1431_v15, %v1470_v51 }
 0x6a9   :  { %p2053_p9 = pnand %p2052_p8, %p2046_p5 }
 0x6ab   :  { %v1548_v41 = vpop.xlane.xlu1 %1547  ;;  %v1509_v14 = vpop.xlane.xlu0 %1508 }
 0x6ac   :  { %v1636_v3 = vsel %vm1305_vm6, %v1631_v38, %v1509_v14 }
 0x6ad   :  { %v1641_v30 = vsel %vm1311_vm7, %v1636_v3, %v1548_v41 }
 0x6af   :  { %v1626_v31 = vpop.xlane.xlu1 %1625  ;;  %v1587_v36 = vpop.xlane.xlu0 %1586 }
 0x6b0   :  { %v1646_v19 = vsel %vm1317_vm8, %v1641_v30, %v1587_v36 }
 0x6b1   :  { %v1651_v52 = vsel %vm1323_vm9, %v1646_v19, %v1626_v31 }
 0x6b2   :  { %v1664_v43 = vrot.slane %v1651_v52, 3 }
 0x6b3   :  { %v1295_v6 = vpop.xlane.xlu1 %1294  ;;  %v1246_v61 = vpop.xlane.xlu0 %1245 }
 0x6b4   :  { %v1665_v11 = vsel %vm1073_vm1, %v1662_v37, %v1664_v43  ;;  %v1327_v13 = vsel %vm1323_vm9, %v1321_v18, %v1295_v6  ;;  %v1316_v28 = vsel %vm1311_vm7, %v1310_v32, %v1246_v61  ;;  %v1678_v56 = vsel %vm1337_vm12, %v1664_v43, 0.0 }
 0x6b5   :  { %v1676_v49 = vsel %vm1329_vm10, %v1665_v11, 0.0  ;;  %v1335_v55 = vsel %vm1329_vm10, %v1327_v13, 0.0 }
 0x6b6   :  { %v1677_v54 = vadd.f32 %v1676_v49, %v1675_v1  ;;  %v1336_v35 = vadd.f32 %v1335_v55, %v1334_v16 }
 0x6b7   :  { %v1298_v9 = vpop.xlane.xlu1 %1297  ;;  %v1272_v50 = vpop.xlane.xlu0 %1271 }
 0x6b8   :  { %v1679_v33 = vadd.f32 %v1678_v56, %v1677_v54  ;;  %v1322_v0 = vsel %vm1317_vm8, %v1316_v28, %v1272_v50 }
 0x6b9   :  { %v1328_v12 = vsel %vm1323_vm9, %v1322_v0, %v1298_v9 }
 0x6ba   :  { %v1680_v23 = vrot.slane %v1679_v33, 4  ;;  %v1338_v8 = vsel %vm1337_vm12, %v1328_v12, 0.0 }
 0x6bb   :  { %v1339_v57 = vadd.f32 %v1338_v8, %v1336_v35 }
 0x6bc   :  { %v1681_v48 = vadd.f32 %v1680_v23, %v1679_v33 }
 0x6bd   :  { %v1340_v7 = vrot.slane %v1339_v57, 4 }
 0x6be   :  { %v1682_v5 = vrot.slane %v1681_v48, 2 }
 0x6bf   :  { %v1341_v63 = vadd.f32 %v1340_v7, %v1339_v57 }
 0x6c0   :  { %v1683_v29 = vadd.f32 %v1682_v5, %v1681_v48 }
 0x6c1   :  { %v1342_v24 = vrot.slane %v1341_v63, 2 }
 0x6c2   :  { %v1684_v53 = vrot.slane %v1683_v29, 1 }
 0x6c3   :  { %v1343_v4 = vadd.f32 %v1342_v24, %v1341_v63 }
 0x6c4   :  { %v1685_v22 = vadd.f32 %v1684_v53, %v1683_v29 }
 0x6c5   :  { %v1344_v26 = vrot.slane %v1343_v4, 1 }
 0x6c7   :  { %v1345_v21 = vadd.f32 %v1344_v26, %v1343_v4 }
 0x6c9   :  { %v1686_v10 = vsel %vm679_vm11, %v1345_v21, %v1685_v22 }
 0x6ca   :  { %v1694_v2 = vadd.f32 %v1819_v60, %v1686_v10 }
 0x6cc   :  { %v1696_v46 = vsel %vm1695_vm13, %v1694_v2, -inf }
 0x6cd   :  { %1697 = vmax.xlane.f32.xlu0 %v1696_v46 }
 0x756   :  { %v1698_v25 = vpop.xlane.xlu0 %1697 }
 0x757   :  { %v1699_v47 = vsub.f32 %v1694_v2, %v1698_v25 }
 0x759   :  { %v1700_v51 = vmul.f32 1.442695, %v1699_v47 }
 0x75b   :  { %2021 = vpow2.f32 %v1700_v51 }
 0x768   :  { %v2022_v15 = vpop.eup %2021 }
 0x769   :  { %v1702_v62 = vsel %vm1695_vm13, %v2022_v15, 0.0 }
 0x76a   :  { %1703 = vadd.xlane.f32.xlu1 %v1702_v62 }
 0x7f3   :  { %v1704_v27 = vpop.xlane.xlu1 %1703 }
 0x7f4   :  { %2023 = vrcp.f32 %v1704_v27 }
 0x801   :  { %v2024_v37 = vpop.eup %2023 }
 0x802   :  { %v1706_v38 = vmul.f32 %v2024_v37, %v2022_v15 }
 0x804   :  { %1707 = vst.msk [vmem:[#allocation5] sm:$0x3] %vm1695_vm13, %v1706_v38 }
 0x805   :  { %2056 = shalt.err (!%p2053_p9)
}
 0x806   :  { %1717 = dma.vmem_to_hbm [thread:$0]  %s1715_s24, 32, %s3010_s5, [#allocation4]  }
 0x807   :  { %2067 = dma.done.wait [#allocation4], 32  }
 0x808   :  { %2068 = vsyncadd [#allocation4], 4294967264 }
 0x809   :  { %1721 = vsyncpa [#allocation3], 1 }
 0x80a   :  { %1722 = vsyncpa [#allocation4], 1 }

</bundles_post_ra>
